<compile_context>
chip_gen: v7x
topology: tpu7x:2x2x1
jax: 0.10.0
libtpu: 0.0.40
codegen_flags: <defaults>
</compile_context>

<pallas_src>
import functools

import jax
import jax.numpy as jnp
from jax.experimental import pallas as pl
from jax.experimental.pallas import tpu as pltpu

IN_DIM = 2
HID = 256
OUT_DIM = 1


def _mlp_kernel(xT_ref, w1_ref, b1_ref, w2_ref, b2_ref, w5_ref, b5_ref, o_ref,
                *, matmul_dtype, act_dtype):
    """Whole forward pass for one batch tile, feature-major, fully in VMEM.

    xT_ref : [IN_DIM, TB]   (batch on lanes)
    w1_ref : [HID, IN_DIM]  (PyTorch-native [out, in])
    w2_ref : [HID, HID]     (already in matmul_dtype — cast hoisted to wrapper)
    w5_ref : [OUT_DIM, HID]
    b*_ref : [out, 1]       (f32)
    o_ref  : [OUT_DIM, TB]  (lane-dense output row)
    """
    x0 = xT_ref[0:1, :].astype(jnp.float32)                 # [1, TB]
    x1 = xT_ref[1:2, :].astype(jnp.float32)                 # [1, TB]

    # fc1 (K=2): two VPU broadcast-FMAs instead of a skinny MXU contraction.
    w1 = w1_ref[...]                                          # [HID, 2]
    z1 = w1[:, 0:1] * x0 + w1[:, 1:2] * x1 + b1_ref[...]      # [HID, TB] f32

    # tanh on the EUP; optionally bf16 to double EUP throughput (v6e/v7x).
    h1 = jnp.tanh(z1.astype(act_dtype))                       # [HID, TB] act_dtype
    h1_f32 = h1.astype(jnp.float32)

    # fc2: the only real matmul. W2 was pre-cast in the wrapper; only h1 is
    # narrowed here (no-op if act_dtype == matmul_dtype). f32 accumulation.
    z2 = jnp.dot(w2_ref[...], h1.astype(matmul_dtype),
                 preferred_element_type=jnp.float32)           # [HID, TB] f32
    h2 = jnp.tanh((z2 + b2_ref[...]).astype(act_dtype)).astype(jnp.float32) + h1_f32

    # fc5: [1, HID] @ [HID, TB] -> lane-dense [1, TB].
    y = jnp.dot(w5_ref[...], h2, preferred_element_type=jnp.float32) + b5_ref[...]
    o_ref[...] = y.astype(o_ref.dtype)


def _round128(v):
    return ((v + 127) // 128) * 128


def _pick_tile_b(n):
    """Adaptive batch tile: tiny batches get the smallest legal lane-multiple
    tile (no wasted EUP work on padding); larger batches are split into >= 2
    programs (keeps both v7x TensorCores busy) and capped at 2048 to amortize
    per-grid-step overhead while staying well inside VMEM."""
    if n <= 128:
        return 128
    return min(2048, _round128((n + 1) // 2))


def _default_fast_flags():
    """(use_bf16_matmul, use_bf16_tanh) defaults per chip generation.
    v5-class chips have no bf16 VPU/EUP, so keep everything f32 there."""
    try:
        kind = jax.devices()[0].device_kind.lower()
    except Exception:  # pragma: no cover
        kind = ""
    is_v5 = "v5" in kind
    return (not is_v5, not is_v5)


@functools.partial(jax.jit,
                   static_argnames=("tile_b", "use_bf16_matmul", "use_bf16_tanh"))
def u_net_forward(x, w1, b1, w2, b2, w5, b5, *, tile_b=None,
                  use_bf16_matmul=True, use_bf16_tanh=True):
    """x: [N, 2] -> [N, 1]. Weights in PyTorch-native [out, in] layout,
    biases as [out, 1]."""
    assert x.ndim == 2 and x.shape[1] == IN_DIM

    n = x.shape[0]
    if tile_b is None:
        tile_b = _pick_tile_b(n)
    assert tile_b % 128 == 0, "tile_b must be a multiple of 128 (lane width)"

    n_pad = ((n + tile_b - 1) // tile_b) * tile_b
    x_p = x if n_pad == n else jnp.pad(x, ((0, n_pad - n), (0, 0)))
    xT = x_p.T                                        # [IN_DIM, n_pad], batch on lanes

    grid = (n_pad // tile_b,)
    matmul_dtype = jnp.bfloat16 if use_bf16_matmul else jnp.float32
    act_dtype = jnp.bfloat16 if use_bf16_tanh else jnp.float32

    # Hoist the W2 cast out of the kernel: done once per call, not per grid step,
    # and it also halves W2's DMA bytes / double-buffered VMEM footprint.
    w2_in = w2.astype(matmul_dtype) if use_bf16_matmul else w2

    weight_bytes = (4 * (HID * IN_DIM + HID + HID + OUT_DIM * HID + OUT_DIM)
                    + w2_in.dtype.itemsize * HID * HID)
    cost = pl.CostEstimate(
        flops=2 * n_pad * (IN_DIM * HID + HID * HID + HID * OUT_DIM),
        transcendentals=2 * HID * n_pad,
        bytes_accessed=weight_bytes + 4 * n_pad * (IN_DIM + OUT_DIM),
    )

    # Big tiles exceed the default scoped-VMEM limit (16 MiB v5e / 32 MiB v6e,v7x);
    # size the limit to the live intermediates (several [HID, TB] f32 buffers)
    # plus weights & double-buffered I/O, capped under v7x's 64 MiB ceiling.
    vmem_limit = int(min(64 * 1024 * 1024,
                         max(16 * 1024 * 1024, 12 * HID * tile_b * 4)))

    full = lambda i: (0, 0)
    yT = pl.pallas_call(
        functools.partial(_mlp_kernel,
                          matmul_dtype=matmul_dtype, act_dtype=act_dtype),
        out_shape=jax.ShapeDtypeStruct((OUT_DIM, n_pad), x.dtype),
        grid_spec=pltpu.PrefetchScalarGridSpec(
            num_scalar_prefetch=0,
            grid=grid,
            in_specs=[
                pl.BlockSpec((IN_DIM, tile_b), lambda i: (0, i)),   # x.T tile
                pl.BlockSpec((HID, IN_DIM), full),                  # W1 [out,in]
                pl.BlockSpec((HID, 1), full),                       # b1
                pl.BlockSpec((HID, HID), full),                     # W2 (pre-cast)
                pl.BlockSpec((HID, 1), full),                       # b2
                pl.BlockSpec((OUT_DIM, HID), full),                 # W5 [out,in]
                pl.BlockSpec((OUT_DIM, 1), full),                   # b5
            ],
            out_specs=pl.BlockSpec((OUT_DIM, tile_b), lambda i: (0, i)),
        ),
        compiler_params=pltpu.CompilerParams(
            dimension_semantics=("parallel",),
            vmem_limit_bytes=vmem_limit,
        ),
        cost_estimate=cost,
    )(xT, w1, b1, w2_in, b2, w5, b5)

    return yT.T[:n]                                   # [N, OUT_DIM]


def init_params(key):
    """PyTorch nn.Linear default init: U(-1/sqrt(fan_in), 1/sqrt(fan_in)),
    weights kept in native [out, in] layout, biases as [out, 1]."""
    def linear(k, fan_in, fan_out):
        kw, kb = jax.random.split(k)
        bound = 1.0 / jnp.sqrt(fan_in)
        w = jax.random.uniform(kw, (fan_out, fan_in), jnp.float32, -bound, bound)
        b = jax.random.uniform(kb, (fan_out, 1), jnp.float32, -bound, bound)
        return w, b

    k1, k2, k5 = jax.random.split(key, 3)
    w1, b1 = linear(k1, IN_DIM, HID)
    w2, b2 = linear(k2, HID, HID)
    w5, b5 = linear(k5, HID, OUT_DIM)
    return w1, b1, w2, b2, w5, b5


def reference_forward(x, w1, b1, w2, b2, w5, b5):
    h1 = jnp.tanh(x @ w1.T + b1[:, 0])
    h2 = jnp.tanh(h1 @ w2.T + b2[:, 0]) + h1
    return h2 @ w5.T + b5[:, 0]


if __name__ == "__main__":
    key = jax.random.PRNGKey(0)
    kx, kp = jax.random.split(key)

    params = init_params(kp)

    # Small batch of 2-D points.
    N = 8
    x = jax.random.normal(kx, (N, IN_DIM), jnp.float32)
    ref = reference_forward(x, *params)

    # Exact-semantics f32 path: tight check.
    out_f32 = jax.block_until_ready(
        u_net_forward(x, *params, use_bf16_matmul=False, use_bf16_tanh=False))
    assert out_f32.shape == (N, OUT_DIM)
    assert jnp.allclose(out_f32, ref, atol=1e-5, rtol=1e-5), "f32 kernel mismatch"

    # Perf-default path (bf16 MXU feed + bf16 tanh on v6e/v7x, f32 on v5e).
    mm_bf16, tanh_bf16 = _default_fast_flags()
    out_fast = jax.block_until_ready(
        u_net_forward(x, *params, use_bf16_matmul=mm_bf16, use_bf16_tanh=tanh_bf16))
    assert out_fast.shape == (N, OUT_DIM)
    assert jnp.allclose(out_fast, ref, atol=5e-2, rtol=5e-2), "fast-path mismatch"

    # Ragged batch (exercises padding, >=2 grid programs, larger tiles).
    N2 = 300
    x2 = jax.random.normal(kx, (N2, IN_DIM), jnp.float32)
    out2 = jax.block_until_ready(
        u_net_forward(x2, *params, use_bf16_matmul=False, use_bf16_tanh=False))
    assert out2.shape == (N2, OUT_DIM)
    assert jnp.allclose(out2, reference_forward(x2, *params), atol=1e-5, rtol=1e-5), \
        "padded-batch kernel mismatch"

    print("KERNEL_OK")
</pallas_src>

<mosaic_0001>
module attributes {stable_mosaic.version = 11 : i64} {
  func.func @_mlp_kernel(%arg0: i32, %arg1: memref<2x128xf32, #tpu.memory_space<vmem>>, %arg2: memref<256x2xf32, #tpu.memory_space<vmem>>, %arg3: memref<256x1xf32, #tpu.memory_space<vmem>>, %arg4: memref<256x256xf32, #tpu.memory_space<vmem>>, %arg5: memref<256x1xf32, #tpu.memory_space<vmem>>, %arg6: memref<1x256xf32, #tpu.memory_space<vmem>>, %arg7: memref<1x1xf32, #tpu.memory_space<vmem>>, %arg8: memref<1x128xf32, #tpu.memory_space<vmem>>) attributes {dimension_semantics = [#tpu.dimension_semantics<parallel>], iteration_bounds = array<i64: 1>, scalar_prefetch = 0 : i64, scratch_operands = 0 : i64, tpu.core_type = #tpu.core_type<tc>, window_params = [{transform_indices = @transform_0, window_bounds = array<i64: 2, 128>}, {pipeline_mode = #tpu.pipeline_mode<synchronous>, transform_indices = @transform_1, window_bounds = array<i64: 256, 2>}, {pipeline_mode = #tpu.pipeline_mode<synchronous>, transform_indices = @transform_2, window_bounds = array<i64: 256, 1>}, {pipeline_mode = #tpu.pipeline_mode<synchronous>, transform_indices = @transform_3, window_bounds = array<i64: 256, 256>}, {pipeline_mode = #tpu.pipeline_mode<synchronous>, transform_indices = @transform_4, window_bounds = array<i64: 256, 1>}, {pipeline_mode = #tpu.pipeline_mode<synchronous>, transform_indices = @transform_5, window_bounds = array<i64: 1, 256>}, {pipeline_mode = #tpu.pipeline_mode<synchronous>, transform_indices = @transform_6, window_bounds = array<i64: 1, 1>}, {transform_indices = @transform_7, window_bounds = array<i64: 1, 128>}]} {
    %c0 = arith.constant 0 : index
    %c0_0 = arith.constant 0 : index
    %0 = vector.load %arg1[%c0, %c0_0] : memref<2x128xf32, #tpu.memory_space<vmem>>, vector<1x128xf32>
    %c1 = arith.constant 1 : index
    %c0_1 = arith.constant 0 : index
    %1 = vector.load %arg1[%c1, %c0_1] : memref<2x128xf32, #tpu.memory_space<vmem>>, vector<1x128xf32>
    %c0_2 = arith.constant 0 : index
    %c0_3 = arith.constant 0 : index
    %2 = vector.load %arg2[%c0_2, %c0_3] : memref<256x2xf32, #tpu.memory_space<vmem>>, vector<256x2xf32>
    %3 = vector.extract_strided_slice %2 {offsets = [0, 0], sizes = [256, 1], strides = [1, 1]} : vector<256x2xf32> to vector<256x1xf32>
    %4 = vector.broadcast %3 : vector<256x1xf32> to vector<256x128xf32>
    %5 = vector.broadcast %0 : vector<1x128xf32> to vector<256x128xf32>
    %6 = arith.mulf %4, %5 : vector<256x128xf32>
    %7 = vector.extract_strided_slice %2 {offsets = [0, 1], sizes = [256, 1], strides = [1, 1]} : vector<256x2xf32> to vector<256x1xf32>
    %8 = vector.broadcast %7 : vector<256x1xf32> to vector<256x128xf32>
    %9 = vector.broadcast %1 : vector<1x128xf32> to vector<256x128xf32>
    %10 = arith.mulf %8, %9 : vector<256x128xf32>
    %11 = arith.addf %6, %10 : vector<256x128xf32>
    %c0_4 = arith.constant 0 : index
    %c0_5 = arith.constant 0 : index
    %12 = vector.load %arg3[%c0_4, %c0_5] : memref<256x1xf32, #tpu.memory_space<vmem>>, vector<256x1xf32>
    %13 = vector.broadcast %12 : vector<256x1xf32> to vector<256x128xf32>
    %14 = arith.addf %11, %13 : vector<256x128xf32>
    %15 = math.tanh %14 : vector<256x128xf32>
    %c0_6 = arith.constant 0 : index
    %c0_7 = arith.constant 0 : index
    %16 = vector.load %arg4[%c0_6, %c0_7] : memref<256x256xf32, #tpu.memory_space<vmem>>, vector<256x256xf32>
    %cst = arith.constant dense<0.000000e+00> : vector<256x128xf32>
    %17 = tpu.matmul %16, %15, %cst {dimension_numbers = #tpu.dot_dimension_numbers<[1], [0], [0], [1], [0, 0, 1, 1], [], []>} : vector<256x256xf32>, vector<256x128xf32>, vector<256x128xf32> -> vector<256x128xf32>
    %c0_8 = arith.constant 0 : index
    %c0_9 = arith.constant 0 : index
    %18 = vector.load %arg5[%c0_8, %c0_9] : memref<256x1xf32, #tpu.memory_space<vmem>>, vector<256x1xf32>
    %19 = vector.broadcast %18 : vector<256x1xf32> to vector<256x128xf32>
    %20 = arith.addf %17, %19 : vector<256x128xf32>
    %21 = math.tanh %20 : vector<256x128xf32>
    %22 = arith.addf %21, %15 : vector<256x128xf32>
    %c0_10 = arith.constant 0 : index
    %c0_11 = arith.constant 0 : index
    %23 = vector.load %arg6[%c0_10, %c0_11] : memref<1x256xf32, #tpu.memory_space<vmem>>, vector<1x256xf32>
    %cst_12 = arith.constant dense<0.000000e+00> : vector<1x128xf32>
    %24 = tpu.matmul %23, %22, %cst_12 {dimension_numbers = #tpu.dot_dimension_numbers<[1], [0], [0], [1], [0, 0, 1, 1], [], []>} : vector<1x256xf32>, vector<256x128xf32>, vector<1x128xf32> -> vector<1x128xf32>
    %c0_13 = arith.constant 0 : index
    %c0_14 = arith.constant 0 : index
    %25 = vector.load %arg7[%c0_13, %c0_14] : memref<1x1xf32, #tpu.memory_space<vmem>>, vector<1x1xf32>
    %26 = vector.broadcast %25 : vector<1x1xf32> to vector<1x128xf32>
    %27 = arith.addf %24, %26 : vector<1x128xf32>
    %c0_15 = arith.constant 0 : index
    %c0_16 = arith.constant 0 : index
    %28 = vector.load %arg8[%c0_15, %c0_16] : memref<1x128xf32, #tpu.memory_space<vmem>>, vector<1x128xf32>
    tpu.vector_store %arg8[%c0_15, %c0_16], %27 {strides = array<i32>} : memref<1x128xf32, #tpu.memory_space<vmem>>, vector<1x128xf32>,
    return
  }
  func.func @transform_0(%arg0: i32) -> (i32, i32) {
    %c0_i32 = arith.constant 0 : i32
    %c0_i32_0 = arith.constant 0 : i32
    return %c0_i32, %arg0 : i32, i32
  }
  func.func @transform_1(%arg0: i32) -> (i32, i32) {
    %c0_i32 = arith.constant 0 : i32
    %c0_i32_0 = arith.constant 0 : i32
    %c0_i32_1 = arith.constant 0 : i32
    return %c0_i32, %c0_i32_0 : i32, i32
  }
  func.func @transform_2(%arg0: i32) -> (i32, i32) {
    %c0_i32 = arith.constant 0 : i32
    %c0_i32_0 = arith.constant 0 : i32
    %c0_i32_1 = arith.constant 0 : i32
    return %c0_i32, %c0_i32_0 : i32, i32
  }
  func.func @transform_3(%arg0: i32) -> (i32, i32) {
    %c0_i32 = arith.constant 0 : i32
    %c0_i32_0 = arith.constant 0 : i32
    %c0_i32_1 = arith.constant 0 : i32
    return %c0_i32, %c0_i32_0 : i32, i32
  }
  func.func @transform_4(%arg0: i32) -> (i32, i32) {
    %c0_i32 = arith.constant 0 : i32
    %c0_i32_0 = arith.constant 0 : i32
    %c0_i32_1 = arith.constant 0 : i32
    return %c0_i32, %c0_i32_0 : i32, i32
  }
  func.func @transform_5(%arg0: i32) -> (i32, i32) {
    %c0_i32 = arith.constant 0 : i32
    %c0_i32_0 = arith.constant 0 : i32
    %c0_i32_1 = arith.constant 0 : i32
    return %c0_i32, %c0_i32_0 : i32, i32
  }
  func.func @transform_6(%arg0: i32) -> (i32, i32) {
    %c0_i32 = arith.constant 0 : i32
    %c0_i32_0 = arith.constant 0 : i32
    %c0_i32_1 = arith.constant 0 : i32
    return %c0_i32, %c0_i32_0 : i32, i32
  }
  func.func @transform_7(%arg0: i32) -> (i32, i32) {
    %c0_i32 = arith.constant 0 : i32
    %c0_i32_0 = arith.constant 0 : i32
    return %c0_i32, %arg0 : i32, i32
  }
}

</mosaic_0001>

<bundles_post_ra>
// kernel: u_net_forward.1
= control target key start
LH: loop header
LB: loop body
LE: loop exit
PB: predicated region body
PF: predicated region fallthrough
CT: control target
= control target key end

     0   :  { %v1666_v0 = vmov 1   ;;  %v1667_v7 = vmov 0   ;;  %v1668_v35 = vmov 0.0|0.0   ;;  %s2728_s1 = inlined_call_operand.vmem [shape: f32[256,2], index: 1, kind: input, shape index: {}]   ;;  %s2729_s2 = inlined_call_operand.vmem [shape: f32[256,1], index: 2, kind: input, shape index: {}]   ;;  %s2730_s6 = inlined_call_operand.<no memory space> [shape: f32[1,1], index: 6, kind: input, shape index: {}]   ;;  %s2731_s4 = inlined_call_operand.vmem [shape: f32[256,1], index: 4, kind: input, shape index: {}]   ;;  %s2732_s0 = inlined_call_operand.vmem [shape: f32[2,128], index: 0, kind: input, shape index: {}]   ;;  %s2733_s3 = inlined_call_operand.vmem [shape: f32[256,256], index: 3, kind: input, shape index: {}]   ;;  %s2734_s5 = inlined_call_operand.vmem [shape: f32[1,256], index: 5, kind: input, shape index: {}]   ;;  %s2735_s7 = inlined_call_operand.vmem [shape: f32[1,128], index: 7, kind: output, shape index: {}]  }
   0x1   :  { %1506 = vset.pattern.permute.xlu0 %v1666_v0  ;;  %1504 = vset.pattern.permute.xlu1 %v1666_v0  ;;  %v1714_v1 = vld [vmem:[%s2728_s1 + $0x10] sm:$0xff]  ;;  %v30_v2 = vld [vmem:[%s2728_s1] sm:$0xff]  ;;  %v31_v4 = vld [vmem:[%s2728_s1 + $0x8] sm:$0xff]  ;;  %v12_v28 = vstv %s2730_s6 }
   0x2   :  { %267 = vperm.xlu0 %1506, %v1714_v1   ;;  %259 = vperm.xlu1 %1504, %v30_v2   ;;  %v34_v3 = vld [vmem:[%s2728_s1 + $0x20] sm:$0xff]  ;;  %v36_v5 = vld [vmem:[%s2728_s1 + $0x30] sm:$0xff]  ;;  %v33_v6 = vld [vmem:[%s2728_s1 + $0x18] sm:$0xff]  ;;  %13 = vst [vmem:[#allocation2] sm:$0x1] %v12_v28 }
   0x3   :  { %v38_v8 = vld [vmem:[%s2728_s1 + $0x40] sm:$0xff]  ;;  %v40_v9 = vld [vmem:[%s2728_s1 + $0x50] sm:$0xff]  ;;  %v35_v13 = vld [vmem:[%s2728_s1 + $0x28] sm:$0xff]  ;;  %1389 = vmatprep.subr.bf16.mxu0 %v1668_v35  ;;  %1469 = vmatprep.subr.bf16.mxu1 %v1668_v35 }
   0x4   :  { %v454_v10 = vld [vmem:[%s2729_s2] sm:$0xff]  ;;  %v1753_v12 = vld [vmem:[%s2728_s1 + $0x70] sm:$0xff]  ;;  %v37_v20 = vld [vmem:[%s2728_s1 + $0x38] sm:$0xff] }
   0x5   :  { %v1746_v11 = vld [vmem:[%s2728_s1 + $0x60] sm:$0xff]  ;;  %v1768_v15 = vld [vmem:[%s2728_s1 + $0x90] sm:$0xff]  ;;  %v39_v25 = vld [vmem:[%s2728_s1 + $0x48] sm:$0xff] }
   0x6   :  { %275 = vperm.xlu0 %1506, %v34_v3   ;;  %263 = vperm.xlu1 %1504, %v31_v4   ;;  %v1762_v14 = vld [vmem:[%s2728_s1 + $0x80] sm:$0xff]  ;;  %v456_v17 = vld [vmem:[%s2729_s2 + $0x10] sm:$0xff]  ;;  %v455_v26 = vld [vmem:[%s2729_s2 + $0x8] sm:$0xff] }
   0x7   :  { %v1775_v16 = vld [vmem:[%s2728_s1 + $0xa0] sm:$0xff]  ;;  %v1785_v18 = vld [vmem:[%s2728_s1 + $0xb0] sm:$0xff]  ;;  %v457_v29 = vld [vmem:[%s2729_s2 + $0x18] sm:$0xff] }
   0x8   :  { %v1791_v19 = vld [vmem:[%s2728_s1 + $0xc0] sm:$0xff]  ;;  %v1800_v21 = vld [vmem:[%s2728_s1 + $0xd0] sm:$0xff]  ;;  %v459_v30 = vld [vmem:[%s2729_s2 + $0x28] sm:$0xff] }
   0x9   :  { %v1807_v22 = vld [vmem:[%s2728_s1 + $0xe0] sm:$0xff]  ;;  %v1816_v24 = vld [vmem:[%s2728_s1 + $0xf0] sm:$0xff]  ;;  %v41_v31 = vld [vmem:[%s2728_s1 + $0x58] sm:$0xff] }
   0xa   :  { %283 = vperm.xlu0 %1506, %v36_v5   ;;  %1505 = vset.pattern.permute.xlu1 %v1667_v7  ;;  %v458_v23 = vld [vmem:[%s2729_s2 + $0x20] sm:$0xff]  ;;  %v460_v27 = vld [vmem:[%s2729_s2 + $0x30] sm:$0xff]  ;;  %v461_v32 = vld [vmem:[%s2729_s2 + $0x38] sm:$0xff] }
   0xb   :  { %79 = vperm.xlu1 %1505, %v33_v6   ;;  %v463_v33 = vld [vmem:[%s2729_s2 + $0x48] sm:$0xff]  ;;  %v462_v34 = vld [vmem:[%s2729_s2 + $0x40] sm:$0xff]  ;;  %v465_v36 = vld [vmem:[%s2729_s2 + $0x58] sm:$0xff] }
   0xc   :  { %v467_v37 = vld [vmem:[%s2729_s2 + $0x68] sm:$0xff]  ;;  %v469_v39 = vld [vmem:[%s2729_s2 + $0x78] sm:$0xff]  ;;  %v464_v41 = vld [vmem:[%s2729_s2 + $0x50] sm:$0xff] }
   0xd   :  { %v43_v38 = vld [vmem:[%s2728_s1 + $0x68] sm:$0xff]  ;;  %v473_v42 = vld [vmem:[%s2729_s2 + $0x98] sm:$0xff]  ;;  %v466_v48 = vld [vmem:[%s2729_s2 + $0x60] sm:$0xff] }
   0xe   :  { %291 = vperm.xlu0 %1506, %v38_v8   ;;  %v471_v40 = vld [vmem:[%s2729_s2 + $0x88] sm:$0xff]  ;;  %v45_v44 = vld [vmem:[%s2728_s1 + $0x78] sm:$0xff]  ;;  %v790_v52 = vld [vmem:[%s2731_s4 + $0x80] sm:$0xff] }
   0xf   :  { %1507 = vset.pattern.permute.xlu1 %v1666_v0  ;;  %v475_v43 = vld [vmem:[%s2729_s2 + $0xa8] sm:$0xff]  ;;  %v477_v45 = vld [vmem:[%s2729_s2 + $0xb8] sm:$0xff]  ;;  %v774_v56 = vld [vmem:[%s2731_s4] sm:$0xff] }
  0x10   :  { %271 = vperm.xlu1 %1507, %v33_v6   ;;  %v479_v46 = vld [vmem:[%s2729_s2 + $0xc8] sm:$0xff]  ;;  %v481_v47 = vld [vmem:[%s2729_s2 + $0xd8] sm:$0xff]  ;;  %v792_v59 = vld [vmem:[%s2731_s4 + $0x90] sm:$0xff] }
  0x11   :  { %v483_v49 = vld [vmem:[%s2729_s2 + $0xe8] sm:$0xff]  ;;  %v468_v62 = vld [vmem:[%s2729_s2 + $0x70] sm:$0xff]  ;;  %v49_v6 = vld [vmem:[%s2728_s1 + $0x98] sm:$0xff] }
  0x12   :  { %299 = vperm.xlu0 %1506, %v40_v9   ;;  %v47_v55 = vld [vmem:[%s2728_s1 + $0x88] sm:$0xff]  ;;  %v776_v63 = vld [vmem:[%s2731_s4 + $0x10] sm:$0xff] }
  0x14   :  { %1508 = vset.pattern.permute.xlu1 %v1667_v7 }
  0x15   :  { %488 = vperm.xlu1 %1508, %v454_v10  }
  0x16   :  { %307 = vperm.xlu0 %1506, %v1746_v11  }
  0x19   :  { %84 = vperm.xlu1 %1508, %v34_v3   ;;  %v794_v3 = vld [vmem:[%s2731_s4 + $0xa0] sm:$0xff] }
  0x1a   :  { %315 = vperm.xlu0 %1506, %v1753_v12  }
  0x1d   :  { %89 = vperm.xlu1 %1508, %v35_v13  }
  0x1e   :  { %323 = vperm.xlu0 %1506, %v1762_v14  }
  0x21   :  { %1509 = vset.pattern.permute.xlu1 %v1666_v0 }
  0x22   :  { %331 = vperm.xlu0 %1506, %v1768_v15   ;;  %279 = vperm.xlu1 %1509, %v35_v13   ;;  %v780_v13 = vld [vmem:[%s2731_s4 + $0x30] sm:$0xff] }
  0x26   :  { %339 = vperm.xlu0 %1506, %v1775_v16   ;;  %1510 = vset.pattern.permute.xlu1 %v1667_v7 }
  0x27   :  { %498 = vperm.xlu1 %1510, %v456_v17   ;;  %v470_v17 = vld [vmem:[%s2729_s2 + $0x80] sm:$0xff] }
  0x2a   :  { %347 = vperm.xlu0 %1506, %v1785_v18  }
  0x2b   :  { %94 = vperm.xlu1 %1510, %v36_v5  }
  0x2e   :  { %355 = vperm.xlu0 %1506, %v1791_v19  }
  0x2f   :  { %99 = vperm.xlu1 %1510, %v37_v20  }
  0x32   :  { %363 = vperm.xlu0 %1506, %v1800_v21  }
  0x33   :  { %1511 = vset.pattern.permute.xlu1 %v1666_v0 }
  0x34   :  { %287 = vperm.xlu1 %1511, %v37_v20   ;;  %v798_v20 = vld [vmem:[%s2731_s4 + $0xc0] sm:$0xff] }
  0x36   :  { %371 = vperm.xlu0 %1506, %v1807_v22  }
  0x38   :  { %1512 = vset.pattern.permute.xlu1 %v1667_v7 }
  0x39   :  { %508 = vperm.xlu1 %1512, %v458_v23  }
  0x3a   :  { %379 = vperm.xlu0 %1506, %v1816_v24  }
  0x3d   :  { %104 = vperm.xlu1 %1512, %v38_v8   ;;  %v778_v8 = vld [vmem:[%s2731_s4 + $0x20] sm:$0xff] }
  0x3e   :  { %1535 = vset.pattern.permute.xlu0 %v1667_v7 }
  0x3f   :  { %64 = vperm.xlu0 %1535, %v30_v2  }
  0x41   :  { %109 = vperm.xlu1 %1512, %v39_v25  }
  0x43   :  { %69 = vperm.xlu0 %1535, %v31_v4  }
  0x45   :  { %1513 = vset.pattern.permute.xlu1 %v1666_v0 }
  0x46   :  { %295 = vperm.xlu1 %1513, %v39_v25  }
  0x47   :  { %74 = vperm.xlu0 %1535, %v1714_v1  }
  0x4a   :  { %1514 = vset.pattern.permute.xlu1 %v1667_v7 }
  0x4b   :  { %493 = vperm.xlu0 %1535, %v455_v26   ;;  %518 = vperm.xlu1 %1514, %v460_v27   ;;  %v782_v26 = vld [vmem:[%s2731_s4 + $0x40] sm:$0xff] }
  0x4f   :  { %503 = vperm.xlu0 %1535, %v457_v29   ;;  %114 = vperm.xlu1 %1514, %v40_v9   ;;  %v51_v29 = vld [vmem:[%s2728_s1 + $0xa8] sm:$0xff] }
  0x53   :  { %513 = vperm.xlu0 %1535, %v459_v30   ;;  %119 = vperm.xlu1 %1514, %v41_v31   ;;  %v800_v30 = vld [vmem:[%s2731_s4 + $0xd0] sm:$0xff] }
  0x57   :  { %523 = vperm.xlu0 %1535, %v461_v32   ;;  %1515 = vset.pattern.permute.xlu1 %v1666_v0 }
  0x58   :  { %303 = vperm.xlu1 %1515, %v41_v31  }
  0x5b   :  { %533 = vperm.xlu0 %1535, %v463_v33  }
  0x5c   :  { %1516 = vset.pattern.permute.xlu1 %v1667_v7 }
  0x5d   :  { %528 = vperm.xlu1 %1516, %v462_v34  }
  0x5f   :  { %543 = vperm.xlu0 %1535, %v465_v36   ;;  %v472_v36 = vld [vmem:[%s2729_s2 + $0x90] sm:$0xff] }
  0x61   :  { %124 = vperm.xlu1 %1516, %v1746_v11   ;;  %v796_v11 = vld [vmem:[%s2731_s4 + $0xb0] sm:$0xff] }
  0x63   :  { %553 = vperm.xlu0 %1535, %v467_v37   ;;  %v802_v37 = vld [vmem:[%s2731_s4 + $0xe0] sm:$0xff] }
  0x65   :  { %129 = vperm.xlu1 %1516, %v43_v38  }
  0x67   :  { %563 = vperm.xlu0 %1535, %v469_v39  }
  0x69   :  { %1517 = vset.pattern.permute.xlu1 %v1666_v0 }
  0x6a   :  { %311 = vperm.xlu1 %1517, %v43_v38  }
  0x6b   :  { %573 = vperm.xlu0 %1535, %v471_v40   ;;  %v786_v40 = vld [vmem:[%s2731_s4 + $0x60] sm:$0xff] }
  0x6e   :  { %1518 = vset.pattern.permute.xlu1 %v1667_v7 }
  0x6f   :  { %538 = vperm.xlu1 %1518, %v464_v41   ;;  %583 = vperm.xlu0 %1535, %v473_v42  }
  0x73   :  { %134 = vperm.xlu1 %1518, %v1753_v12   ;;  %593 = vperm.xlu0 %1535, %v475_v43   ;;  %v53_v43 = vld [vmem:[%s2728_s1 + $0xb8] sm:$0xff] }
  0x77   :  { %139 = vperm.xlu1 %1518, %v45_v44   ;;  %603 = vperm.xlu0 %1535, %v477_v45  }
  0x7b   :  { %1519 = vset.pattern.permute.xlu1 %v1666_v0  ;;  %613 = vperm.xlu0 %1535, %v479_v46   ;;  %v2041_v46 = vld [vmem:[%s2732_s0 + $0x1] ss:$0 sm:$0xff] }
  0x7c   :  { %319 = vperm.xlu1 %1519, %v45_v44   ;;  %v804_v44 = vld [vmem:[%s2731_s4 + $0xf0] sm:$0xff] }
  0x7f   :  { %623 = vperm.xlu0 %1535, %v481_v47  }
  0x80   :  { %1520 = vset.pattern.permute.xlu1 %v1667_v7 }
  0x81   :  { %548 = vperm.xlu1 %1520, %v466_v48   ;;  %v1906_v50 = vpop.permute.xlu1 %259  ;;  %v1908_v51 = vpop.permute.xlu0 %267  ;;  %v788_v48 = vld [vmem:[%s2731_s4 + $0x70] sm:$0xff] }
  0x83   :  { %633 = vperm.xlu0 %1535, %v483_v49  }
  0x85   :  { %144 = vperm.xlu1 %1520, %v1762_v14   ;;  %v1914_v53 = vpop.permute.xlu1 %263  ;;  %v1916_v54 = vpop.permute.xlu0 %275 }
  0x87   :  { %888 = vperm.xlu0 %1535, %v790_v52  }
  0x89   :  { %149 = vperm.xlu1 %1520, %v47_v55   ;;  %v1924_v57 = vpop.permute.xlu0 %283 }
  0x8a   :  { %v1926_v58 = vpop.permute.xlu1 %79 }
  0x8b   :  { %808 = vperm.xlu0 %1535, %v774_v56   ;;  %v1256_v56 = vld [vmem:[#allocation2] sm:$0x1] }
  0x8d   :  { %1521 = vset.pattern.permute.xlu1 %v1666_v0  ;;  %v1932_v60 = vpop.permute.xlu0 %291 }
  0x8e   :  { %327 = vperm.xlu1 %1521, %v47_v55   ;;  %v390_v55 = vmul.f32 %v2041_v46, %v1906_v50  ;;  %v391_v50 = vmul.f32 %v2041_v46, %v1914_v53 }
  0x8f   :  { %v1934_v61 = vpop.permute.xlu1 %271  ;;  %898 = vperm.xlu0 %1535, %v792_v59   ;;  %v392_v59 = vmul.f32 %v2041_v46, %v1908_v51 }
  0x90   :  { %v393_v51 = vmul.f32 %v2041_v46, %v1934_v61 }
  0x91   :  { %v1942_v1 = vpop.permute.xlu0 %299 }
  0x92   :  { %1522 = vset.pattern.permute.xlu1 %v1667_v7 }
  0x93   :  { %558 = vperm.xlu1 %1522, %v468_v62   ;;  %818 = vperm.xlu0 %1535, %v776_v63  }
  0x94   :  { %v1945_v2 = vpop.permute.xlu1 %488 }
  0x95   :  { %v1950_v4 = vpop.permute.xlu0 %307 }
  0x97   :  { %154 = vperm.xlu1 %1522, %v1768_v15   ;;  %908 = vperm.xlu0 %1535, %v794_v3  }
  0x98   :  { %v1953_v5 = vpop.permute.xlu1 %84 }
  0x99   :  { %v1961_v9 = vpop.permute.xlu0 %315 }
  0x9b   :  { %159 = vperm.xlu1 %1522, %v49_v6   ;;  %828 = vperm.xlu0 %1535, %v778_v8   ;;  %v474_v8 = vld [vmem:[%s2729_s2 + $0xa0] sm:$0xff] }
  0x9c   :  { %v1963_v10 = vpop.permute.xlu1 %89 }
  0x9d   :  { %v1968_v12 = vpop.permute.xlu0 %323 }
  0x9f   :  { %1523 = vset.pattern.permute.xlu1 %v1666_v0  ;;  %918 = vperm.xlu0 %1535, %v796_v11  }
  0xa0   :  { %335 = vperm.xlu1 %1523, %v49_v6  }
  0xa1   :  { %v1974_v14 = vpop.permute.xlu1 %279  ;;  %v1976_v15 = vpop.permute.xlu0 %331 }
  0xa2   :  { %v395_v61 = vmul.f32 %v2041_v46, %v1974_v14 }
  0xa3   :  { %838 = vperm.xlu0 %1535, %v780_v13  }
  0xa4   :  { %1524 = vset.pattern.permute.xlu1 %v1667_v7 }
  0xa5   :  { %568 = vperm.xlu1 %1524, %v470_v17   ;;  %v1985_v23 = vpop.permute.xlu0 %339 }
  0xa6   :  { %v1987_v25 = vpop.permute.xlu1 %498 }
  0xa7   :  { %928 = vperm.xlu0 %1535, %v798_v20  }
  0xa9   :  { %164 = vperm.xlu1 %1524, %v1775_v16   ;;  %v1993_v27 = vpop.permute.xlu0 %347  ;;  %v784_v16 = vld [vmem:[%s2731_s4 + $0x50] sm:$0xff] }
  0xaa   :  { %v1995_v28 = vpop.permute.xlu1 %94 }
  0xab   :  { %848 = vperm.xlu0 %1535, %v782_v26   ;;  %v394_v26 = vmul.f32 %v2041_v46, %v1916_v54  ;;  %v396_v54 = vmul.f32 %v2041_v46, %v1924_v57 }
  0xad   :  { %169 = vperm.xlu1 %1524, %v51_v29   ;;  %v2003_v31 = vpop.permute.xlu0 %355 }
  0xae   :  { %v2005_v32 = vpop.permute.xlu1 %99 }
  0xaf   :  { %938 = vperm.xlu0 %1535, %v800_v30  }
  0xb1   :  { %1525 = vset.pattern.permute.xlu1 %v1666_v0  ;;  %v2011_v33 = vpop.permute.xlu0 %363 }
  0xb2   :  { %343 = vperm.xlu1 %1525, %v51_v29  }
  0xb3   :  { %v2013_v34 = vpop.permute.xlu1 %287  ;;  %858 = vperm.xlu0 %1535, %v784_v16  }
  0xb4   :  { %v397_v57 = vmul.f32 %v2041_v46, %v2013_v34 }
  0xb5   :  { %v2021_v38 = vpop.permute.xlu0 %371 }
  0xb6   :  { %1526 = vset.pattern.permute.xlu1 %v1667_v7 }
  0xb7   :  { %578 = vperm.xlu1 %1526, %v472_v36   ;;  %948 = vperm.xlu0 %1535, %v802_v37  }
  0xb8   :  { %v509_v39 = vpop.permute.xlu1 %508 }
  0xb9   :  { %v2027_v41 = vpop.permute.xlu0 %379 }
  0xbb   :  { %174 = vperm.xlu1 %1526, %v1785_v18   ;;  %868 = vperm.xlu0 %1535, %v786_v40   ;;  %v2046_v18 = vld [vmem:[%s2732_s0] ss:$0 sm:$0xff] }
  0xbc   :  { %v2030_v42 = vpop.permute.xlu1 %104  ;;  %v230_v29 = vmul.f32 %v2046_v18, %v1953_v5  ;;  %v229_v16 = vmul.f32 %v2046_v18, %v1926_v58  ;;  %v232_v5 = vmul.f32 %v2046_v18, %v1995_v28  ;;  %v231_v14 = vmul.f32 %v2046_v18, %v1963_v10 }
  0xbe   :  { %v65_v45 = vpop.permute.xlu0 %64  ;;  %v426_v40 = vadd.f32 %v394_v26, %v230_v29  ;;  %v427_v28 = vadd.f32 %v395_v61, %v231_v14  ;;  %v400_v14 = vmul.f32 %v2041_v46, %v1942_v1 }
  0xbf   :  { %179 = vperm.xlu1 %1526, %v53_v43   ;;  %958 = vperm.xlu0 %1535, %v804_v44   ;;  %v226_v49 = vmul.f32 %v2046_v18, %v65_v45  ;;  %v428_v45 = vadd.f32 %v396_v54, %v232_v5 }
  0xc0   :  { %v2048_v47 = vpop.permute.xlu1 %109  ;;  %v650_v44 = vadd.f32 %v509_v39, %v426_v40 }
  0xc1   :  { %v422_v62 = vadd.f32 %v390_v55, %v226_v49 }
  0xc2   :  { %v70_v52 = vpop.permute.xlu0 %69 }
  0xc3   :  { %1527 = vset.pattern.permute.xlu1 %v1666_v0  ;;  %878 = vperm.xlu0 %1535, %v788_v48   ;;  %v227_v63 = vmul.f32 %v2046_v18, %v70_v52  ;;  %v646_v13 = vadd.f32 %v1945_v2, %v422_v62  ;;  %v425_v2 = vadd.f32 %v393_v51, %v229_v16 }
  0xc4   :  { %351 = vperm.xlu1 %1527, %v53_v43   ;;  %v233_v52 = vmul.f32 %v2046_v18, %v2005_v32  ;;  %v398_v62 = vmul.f32 %v2041_v46, %v1932_v60  ;;  %v235_v32 = vmul.f32 %v2046_v18, %v2048_v47  ;;  %v476_v60 = vld [vmem:[%s2729_s2 + $0xb0] sm:$0xff] }
  0xc5   :  { %v296_v3 = vpop.permute.xlu1 %295  ;;  %v423_v20 = vadd.f32 %v391_v50, %v227_v63  ;;  %1538 = vtanh.f32 %v646_v13  ;;  %v234_v63 = vmul.f32 %v2046_v18, %v2030_v42 }
  0xc6   :  { %v75_v6 = vpop.permute.xlu0 %74  ;;  %v399_v10 = vmul.f32 %v2041_v46, %v296_v3  ;;  %v429_v39 = vadd.f32 %v397_v57, %v233_v52 }
  0xc7   :  { %v228_v11 = vmul.f32 %v2046_v18, %v75_v6  ;;  %1259 = vperm.xlu0 %1535, %v1256_v56  }
  0xc8   :  { %1528 = vset.pattern.permute.xlu1 %v1667_v7  ;;  %v431_v50 = vadd.f32 %v399_v10, %v235_v32 }
  0xc9   :  { %v424_v17 = vadd.f32 %v392_v59, %v228_v11  ;;  %588 = vperm.xlu1 %1528, %v474_v8  }
  0xca   :  { %v494_v53 = vpop.permute.xlu0 %493  ;;  %v519_v30 = vpop.permute.xlu1 %518 }
  0xcb   :  { %v647_v36 = vadd.f32 %v494_v53, %v423_v20  ;;  %v648_v37 = vadd.f32 %v1987_v25, %v424_v17  ;;  %v55_v25 = vld [vmem:[%s2728_s1 + $0xc8] sm:$0xff]  ;;  %v652_v56 = vadd.f32 %v519_v30, %v428_v45  ;;  %v430_v17 = vadd.f32 %v398_v62, %v234_v63 }
  0xcd   :  { %184 = vperm.xlu1 %1528, %v1791_v19   ;;  %1540 = vtanh.f32 %v647_v36 }
  0xce   :  { %v504_v43 = vpop.permute.xlu0 %503  ;;  %v2084_v58 = vpop.permute.xlu1 %114  ;;  %1542 = vtanh.f32 %v648_v37  ;;  %v57_v37 = vld [vmem:[%s2728_s1 + $0xd8] sm:$0xff] }
  0xcf   :  { %v649_v19 = vadd.f32 %v504_v43, %v425_v2  ;;  %v2097_v34 = vpop.eup %1538 }
  0xd1   :  { %1544 = vtanh.f32 %v649_v19  ;;  %189 = vperm.xlu1 %1528, %v55_v25   ;;  %v236_v19 = vmul.f32 %v2046_v18, %v2084_v58 }
  0xd2   :  { %v514_v48 = vpop.permute.xlu0 %513  ;;  %v120_v49 = vpop.permute.xlu1 %119  ;;  %1546 = vtanh.f32 %v650_v44 }
  0xd3   :  { %v651_v55 = vadd.f32 %v514_v48, %v427_v28  ;;  %v237_v43 = vmul.f32 %v2046_v18, %v120_v49  ;;  %v478_v48 = vld [vmem:[%s2729_s2 + $0xc0] sm:$0xff]  ;;  %v432_v1 = vadd.f32 %v400_v14, %v236_v19 }
  0xd5   :  { %1548 = vtanh.f32 %v651_v55  ;;  %1529 = vset.pattern.permute.xlu1 %v1666_v0 }
  0xd6   :  { %v524_v59 = vpop.permute.xlu0 %523  ;;  %359 = vperm.xlu1 %1529, %v55_v25   ;;  %1550 = vtanh.f32 %v652_v56  ;;  %v59_v56 = vld [vmem:[%s2728_s1 + $0xe8] sm:$0xff] }
  0xd7   :  { %v653_v6 = vadd.f32 %v524_v59, %v429_v39  ;;  %v304_v8 = vpop.permute.xlu1 %303  ;;  %v2105_v3 = vpop.eup %1540 }
  0xd8   :  { %v1390_v11 = vpack.c.bf16 %v2105_v3, %v2097_v34  ;;  %v2112_v51 = vpop.eup %1542  ;;  %v401_v5 = vmul.f32 %v2041_v46, %v304_v8 }
  0xd9   :  { %1552 = vtanh.f32 %v653_v6 }
  0xda   :  { %v534_v42 = vpop.permute.xlu0 %533  ;;  %1530 = vset.pattern.permute.xlu1 %v1667_v7  ;;  %1391 = vmatpush1.bf16.msra.mxu0 %v1390_v11  ;;  %v433_v28 = vadd.f32 %v401_v5, %v237_v43 }
  0xdb   :  { %v2115_v47 = vpop.eup %1544  ;;  %v655_v13 = vadd.f32 %v534_v42, %v431_v50  ;;  %1485 = vmatpush1.bf16.msra.mxu1 %v1390_v11  ;;  %598 = vperm.xlu1 %1530, %v476_v60   ;;  %v480_v60 = vld [vmem:[%s2729_s2 + $0xd0] sm:$0xff] }
  0xdc   :  { %v529_v20 = vpop.permute.xlu1 %528  ;;  %1392 = vmatprep.subr.bf16.mxu0 %v1668_v35  ;;  %v1393_v26 = vpack.c.bf16 %v2115_v47, %v2112_v51  ;;  %1470 = vmatprep.subr.bf16.mxu1 %v1668_v35  ;;  %v2121_v53 = vpop.eup %1546 }
  0xdd   :  { %v654_v29 = vadd.f32 %v529_v20, %v430_v17  ;;  %1554 = vtanh.f32 %v655_v13 }
  0xde   :  { %1394 = vmatpush1.bf16.msra.mxu0 %v1393_v26  ;;  %v544_v44 = vpop.permute.xlu0 %543 }
  0xdf   :  { %v2123_v30 = vpop.eup %1548  ;;  %1556 = vtanh.f32 %v654_v29  ;;  %1486 = vmatpush1.bf16.msra.mxu1 %v1393_v26  ;;  %194 = vperm.xlu1 %1530, %v1800_v21   ;;  %v657_v49 = vadd.f32 %v544_v44, %v433_v28  ;;  %v61_v26 = vld [vmem:[%s2728_s1 + $0xf8] sm:$0xff]  ;;  %v482_v44 = vld [vmem:[%s2729_s2 + $0xe0] sm:$0xff] }
  0xe0   :  { %v125_v16 = vpop.permute.xlu1 %124  ;;  %1395 = vmatprep.subr.bf16.mxu0 %v1668_v35  ;;  %v1396_v36 = vpack.c.bf16 %v2123_v30, %v2121_v53  ;;  %1471 = vmatprep.subr.bf16.mxu1 %v1668_v35  ;;  %v2133_v61 = vpop.eup %1550 }
  0xe1   :  { %1558 = vtanh.f32 %v657_v49  ;;  %v238_v6 = vmul.f32 %v2046_v18, %v125_v16 }
  0xe2   :  { %1397 = vmatpush1.bf16.msra.mxu0 %v1396_v36  ;;  %v554_v8 = vpop.permute.xlu0 %553 }
  0xe3   :  { %v2135_v2 = vpop.eup %1552  ;;  %1487 = vmatpush1.bf16.msra.mxu1 %v1396_v36  ;;  %199 = vperm.xlu1 %1530, %v57_v37  }
  0xe4   :  { %v130_v21 = vpop.permute.xlu1 %129  ;;  %1398 = vmatprep.subr.bf16.mxu0 %v1668_v35  ;;  %v1399_v54 = vpack.c.bf16 %v2135_v2, %v2133_v61  ;;  %1472 = vmatprep.subr.bf16.mxu1 %v1668_v35 }
  0xe5   :  { %v239_v59 = vmul.f32 %v2046_v18, %v130_v21 }
  0xe6   :  { %1400 = vmatpush1.bf16.msra.mxu0 %v1399_v54  ;;  %v564_v19 = vpop.permute.xlu0 %563 }
  0xe7   :  { %1488 = vmatpush1.bf16.msra.mxu1 %v1399_v54  ;;  %v2142_v40 = vpop.eup %1554  ;;  %1531 = vset.pattern.permute.xlu1 %v1666_v0 }
  0xe8   :  { %1401 = vmatprep.subr.bf16.mxu0 %v1668_v35  ;;  %367 = vperm.xlu1 %1531, %v57_v37  }
  0xe9   :  { %v2147_v25 = vpop.eup %1556  ;;  %v312_v57 = vpop.permute.xlu1 %311  ;;  %1473 = vmatprep.subr.bf16.mxu1 %v1668_v35 }
  0xea   :  { %v1402_v45 = vpack.c.bf16 %v2142_v40, %v2147_v25  ;;  %v403_v10 = vmul.f32 %v2041_v46, %v312_v57 }
  0xeb   :  { %v2168_v62 = vpop.eup %1558 }
  0xec   :  { %1403 = vmatpush1.bf16.msra.mxu0 %v1402_v45  ;;  %1489 = vmatpush1.bf16.msra.mxu1 %v1402_v45  ;;  %v435_v63 = vadd.f32 %v403_v10, %v239_v59  ;;  %v484_v45 = vld [vmem:[%s2729_s2 + $0xf0] sm:$0xff] }
  0xed   :  { %1532 = vset.pattern.permute.xlu1 %v1667_v7  ;;  %1404 = vmatprep.subr.bf16.mxu0 %v1668_v35 }
  0xee   :  { %608 = vperm.xlu1 %1532, %v478_v48   ;;  %v539_v58 = vpop.permute.xlu1 %538  ;;  %1474 = vmatprep.subr.bf16.mxu1 %v1668_v35  ;;  %v659_v42 = vadd.f32 %v554_v8, %v435_v63  ;;  %v574_v8 = vpop.permute.xlu0 %573 }
  0xef   :  { %v656_v52 = vadd.f32 %v539_v58, %v432_v1  ;;  %v791_v58 = vld [vmem:[%s2731_s4 + $0x88] sm:$0xff] }
  0xf1   :  { %1560 = vtanh.f32 %v656_v52 }
  0xf2   :  { %204 = vperm.xlu1 %1532, %v1807_v22   ;;  %v135_v55 = vpop.permute.xlu1 %134  ;;  %v402_v22 = vmul.f32 %v2041_v46, %v1950_v4  ;;  %1562 = vtanh.f32 %v659_v42 }
  0xf3   :  { %v240_v5 = vmul.f32 %v2046_v18, %v135_v55 }
  0xf4   :  { %v434_v13 = vadd.f32 %v402_v22, %v238_v6  ;;  %v775_v22 = vld [vmem:[%s2731_s4 + $0x8] sm:$0xff] }
  0xf6   :  { %209 = vperm.xlu1 %1532, %v59_v56   ;;  %v140_v39 = vpop.permute.xlu1 %139 }
  0xf7   :  { %v241_v36 = vmul.f32 %v2046_v18, %v140_v39  ;;  %v406_v39 = vmul.f32 %v2041_v46, %v1968_v12  ;;  %v793_v12 = vld [vmem:[%s2731_s4 + $0x98] sm:$0xff] }
  0xfa   :  { %1533 = vset.pattern.permute.xlu1 %v1666_v0 }
  0xfb   :  { %v2171_v32 = vpop.eup %1560  ;;  %375 = vperm.xlu1 %1533, %v59_v56   ;;  %v320_v50 = vpop.permute.xlu1 %319 }
  0xfc   :  { %v1405_v11 = vpack.c.bf16 %v2168_v62, %v2171_v32  ;;  %v405_v29 = vmul.f32 %v2041_v46, %v320_v50  ;;  %v2190_v37 = vpop.eup %1562 }
  0xfe   :  { %1406 = vmatpush1.bf16.msra.mxu0 %v1405_v11  ;;  %1490 = vmatpush1.bf16.msra.mxu1 %v1405_v11  ;;  %v437_v21 = vadd.f32 %v405_v29, %v241_v36 }
  0xff   :  { %1534 = vset.pattern.permute.xlu1 %v1667_v7  ;;  %1407 = vmatprep.subr.bf16.mxu0 %v1668_v35 }
 0x100   :  { %618 = vperm.xlu1 %1534, %v480_v60   ;;  %v549_v4 = vpop.permute.xlu1 %548  ;;  %1475 = vmatprep.subr.bf16.mxu1 %v1668_v35  ;;  %v661_v57 = vadd.f32 %v564_v19, %v437_v21  ;;  %v779_v21 = vld [vmem:[%s2731_s4 + $0x28] sm:$0xff] }
 0x101   :  { %v658_v17 = vadd.f32 %v549_v4, %v434_v13  ;;  %v777_v13 = vld [vmem:[%s2731_s4 + $0x18] sm:$0xff] }
 0x103   :  { %1564 = vtanh.f32 %v658_v17  ;;  %v711_v17 = vld [vmem:[%s2733_s3 + $0x8] sm:$0xff] }
 0x104   :  { %214 = vperm.xlu1 %1534, %v1816_v24   ;;  %v145_v20 = vpop.permute.xlu1 %144  ;;  %v404_v24 = vmul.f32 %v2041_v46, %v1961_v9  ;;  %1566 = vtanh.f32 %v661_v57  ;;  %1030 = vmatprep.mubr.f32.mxu0 %v711_v17  ;;  %v408_v57 = vmul.f32 %v2041_v46, %v1976_v15  ;;  %v781_v15 = vld [vmem:[%s2731_s4 + $0x38] sm:$0xff] }
 0x105   :  { %v242_v59 = vmul.f32 %v2046_v18, %v145_v20  ;;  %v745_v20 = vld [vmem:[%s2733_s3 + $0x118] sm:$0xff] }
 0x106   :  { %1115 = vmatprep.mubr.f32.mxu1 %v745_v20 }
 0x107   :  { %v438_v11 = vadd.f32 %v406_v39, %v242_v59 }
 0x108   :  { %219 = vperm.xlu1 %1534, %v61_v26   ;;  %v150_v16 = vpop.permute.xlu1 %149 }
 0x109   :  { %v243_v52 = vmul.f32 %v2046_v18, %v150_v16 }
 0x10c   :  { %1536 = vset.pattern.permute.xlu1 %v1666_v0  ;;  %v436_v0 = vadd.f32 %v404_v24, %v240_v5 }
 0x10d   :  { %v2193_v54 = vpop.eup %1564  ;;  %383 = vperm.xlu1 %1536, %v61_v26   ;;  %v328_v43 = vpop.permute.xlu1 %327  ;;  %v795_v26 = vld [vmem:[%s2731_s4 + $0xa8] sm:$0xff] }
 0x10e   :  { %v1408_v14 = vpack.c.bf16 %v2190_v37, %v2193_v54  ;;  %v407_v49 = vmul.f32 %v2041_v46, %v328_v43  ;;  %v2217_v55 = vpop.eup %1566 }
 0x10f   :  { %2741 = vst [vmem:[#allocation3_spill] sm:$0xff] %v2217_v55 }
 0x110   :  { %1409 = vmatpush1.bf16.msra.mxu0 %v1408_v14  ;;  %1491 = vmatpush1.bf16.msra.mxu1 %v1408_v14  ;;  %v439_v56 = vadd.f32 %v407_v49, %v243_v52 }
 0x111   :  { %1537 = vset.pattern.permute.xlu1 %v1667_v7  ;;  %1410 = vmatprep.subr.bf16.mxu0 %v1668_v35  ;;  %v485_v7 = vld [vmem:[%s2729_s2 + $0xf8] sm:$0xff] }
 0x112   :  { %628 = vperm.xlu1 %1537, %v482_v44   ;;  %v559_v9 = vpop.permute.xlu1 %558  ;;  %1476 = vmatprep.subr.bf16.mxu1 %v1668_v35  ;;  %v663_v50 = vadd.f32 %v574_v8, %v439_v56  ;;  %v783_v56 = vld [vmem:[%s2731_s4 + $0x48] sm:$0xff] }
 0x113   :  { %v660_v28 = vadd.f32 %v559_v9, %v436_v0  ;;  %v584_v0 = vpop.permute.xlu0 %583  ;;  %v797_v9 = vld [vmem:[%s2731_s4 + $0xb8] sm:$0xff] }
 0x115   :  { %1568 = vtanh.f32 %v660_v28 }
 0x116   :  { %638 = vperm.xlu1 %1537, %v484_v45   ;;  %v155_v48 = vpop.permute.xlu1 %154  ;;  %1570 = vtanh.f32 %v663_v50  ;;  %v801_v50 = vld [vmem:[%s2731_s4 + $0xd8] sm:$0xff] }
 0x117   :  { %v244_v14 = vmul.f32 %v2046_v18, %v155_v48 }
 0x119   :  { %v440_v45 = vadd.f32 %v408_v57, %v244_v14 }
 0x11a   :  { %643 = vperm.xlu1 %1537, %v485_v7   ;;  %v160_v1 = vpop.permute.xlu1 %159 }
 0x11b   :  { %v245_v36 = vmul.f32 %v2046_v18, %v160_v1  ;;  %v799_v1 = vld [vmem:[%s2731_s4 + $0xc8] sm:$0xff] }
 0x11e   :  { %893 = vperm.xlu1 %1537, %v791_v58  }
 0x11f   :  { %v2219_v10 = vpop.eup %1568  ;;  %v336_v63 = vpop.permute.xlu1 %335 }
 0x120   :  { %v1411_v6 = vpack.c.bf16 %v2217_v55, %v2219_v10  ;;  %v409_v29 = vmul.f32 %v2041_v46, %v336_v63  ;;  %v2251_v24 = vpop.eup %1570 }
 0x121   :  { %2742 = vst [vmem:[#allocation4_spill] sm:$0xff] %v2251_v24 }
 0x122   :  { %813 = vperm.xlu1 %1537, %v775_v22   ;;  %1412 = vmatpush1.bf16.msra.mxu0 %v1411_v6  ;;  %v441_v5 = vadd.f32 %v409_v29, %v245_v36  ;;  %v787_v29 = vld [vmem:[%s2731_s4 + $0x68] sm:$0xff] }
 0x123   :  { %1492 = vmatpush1.bf16.msra.mxu1 %v1411_v6  ;;  %1413 = vmatprep.subr.bf16.mxu0 %v1668_v35 }
 0x124   :  { %v569_v60 = vpop.permute.xlu1 %568  ;;  %1477 = vmatprep.subr.bf16.mxu1 %v1668_v35  ;;  %v665_v28 = vadd.f32 %v584_v0, %v441_v5  ;;  %v805_v5 = vld [vmem:[%s2731_s4 + $0xf8] sm:$0xff] }
 0x125   :  { %v662_v42 = vadd.f32 %v569_v60, %v438_v11  ;;  %v594_v60 = vpop.permute.xlu0 %593 }
 0x126   :  { %903 = vperm.xlu1 %1537, %v793_v12   ;;  %v410_v12 = vmul.f32 %v2041_v46, %v1985_v23  ;;  %v803_v23 = vld [vmem:[%s2731_s4 + $0xe8] sm:$0xff] }
 0x127   :  { %1572 = vtanh.f32 %v662_v42 }
 0x128   :  { %v165_v4 = vpop.permute.xlu1 %164  ;;  %1574 = vtanh.f32 %v665_v28  ;;  %v789_v28 = vld [vmem:[%s2731_s4 + $0x78] sm:$0xff] }
 0x129   :  { %v246_v6 = vmul.f32 %v2046_v18, %v165_v4  ;;  %v785_v4 = vld [vmem:[%s2731_s4 + $0x58] sm:$0xff] }
 0x12a   :  { %823 = vperm.xlu1 %1537, %v777_v13  }
 0x12b   :  { %v442_v13 = vadd.f32 %v410_v12, %v246_v6  ;;  %v414_v12 = vmul.f32 %v2041_v46, %v2003_v31 }
 0x12c   :  { %v170_v16 = vpop.permute.xlu1 %169 }
 0x12d   :  { %v247_v39 = vmul.f32 %v2046_v18, %v170_v16 }
 0x12e   :  { %913 = vperm.xlu1 %1537, %v795_v26  }
 0x131   :  { %v2253_v43 = vpop.eup %1572  ;;  %v344_v19 = vpop.permute.xlu1 %343 }
 0x132   :  { %2743 = vst [vmem:[#allocation5_spill] sm:$0xff] %v2253_v43  ;;  %833 = vperm.xlu1 %1537, %v779_v21   ;;  %v1414_v44 = vpack.c.bf16 %v2251_v24, %v2253_v43  ;;  %v411_v58 = vmul.f32 %v2041_v46, %v344_v19  ;;  %v2276_v59 = vpop.eup %1574 }
 0x134   :  { %1415 = vmatpush1.bf16.msra.mxu0 %v1414_v44  ;;  %1493 = vmatpush1.bf16.msra.mxu1 %v1414_v44  ;;  %v443_v63 = vadd.f32 %v411_v58, %v247_v39 }
 0x135   :  { %1416 = vmatprep.subr.bf16.mxu0 %v1668_v35  ;;  %1478 = vmatprep.subr.bf16.mxu1 %v1668_v35 }
 0x136   :  { %923 = vperm.xlu1 %1537, %v797_v9   ;;  %v579_v48 = vpop.permute.xlu1 %578  ;;  %v667_v42 = vadd.f32 %v594_v60, %v443_v63 }
 0x137   :  { %v664_v7 = vadd.f32 %v579_v48, %v440_v45  ;;  %v412_v45 = vmul.f32 %v2041_v46, %v1993_v27  ;;  %v604_v48 = vpop.permute.xlu0 %603 }
 0x139   :  { %1576 = vtanh.f32 %v664_v7 }
 0x13a   :  { %843 = vperm.xlu1 %1537, %v781_v15   ;;  %v175_v49 = vpop.permute.xlu1 %174  ;;  %1578 = vtanh.f32 %v667_v42 }
 0x13b   :  { %v248_v0 = vmul.f32 %v2046_v18, %v175_v49  ;;  %v614_v60 = vpop.permute.xlu0 %613 }
 0x13d   :  { %v444_v15 = vadd.f32 %v412_v45, %v248_v0 }
 0x13e   :  { %933 = vperm.xlu1 %1537, %v799_v1   ;;  %v180_v52 = vpop.permute.xlu1 %179 }
 0x13f   :  { %v249_v21 = vmul.f32 %v2046_v18, %v180_v52  ;;  %v624_v0 = vpop.permute.xlu0 %623 }
 0x142   :  { %853 = vperm.xlu1 %1537, %v783_v56  }
 0x143   :  { %v2278_v22 = vpop.eup %1576  ;;  %v352_v8 = vpop.permute.xlu1 %351 }
 0x144   :  { %v1417_v11 = vpack.c.bf16 %v2276_v59, %v2278_v22  ;;  %v413_v36 = vmul.f32 %v2041_v46, %v352_v8  ;;  %v2304_v14 = vpop.eup %1578 }
 0x146   :  { %943 = vperm.xlu1 %1537, %v801_v50   ;;  %1418 = vmatpush1.bf16.msra.mxu0 %v1417_v11  ;;  %v445_v44 = vadd.f32 %v413_v36, %v249_v21 }
 0x147   :  { %1494 = vmatpush1.bf16.msra.mxu1 %v1417_v11  ;;  %1419 = vmatprep.subr.bf16.mxu0 %v1668_v35 }
 0x148   :  { %v589_v17 = vpop.permute.xlu1 %588  ;;  %1479 = vmatprep.subr.bf16.mxu1 %v1668_v35  ;;  %v669_v7 = vadd.f32 %v604_v48, %v445_v44 }
 0x149   :  { %v666_v20 = vadd.f32 %v589_v17, %v442_v13 }
 0x14a   :  { %863 = vperm.xlu1 %1537, %v785_v4  }
 0x14b   :  { %1580 = vtanh.f32 %v666_v20 }
 0x14c   :  { %v185_v26 = vpop.permute.xlu1 %184  ;;  %1582 = vtanh.f32 %v669_v7 }
 0x14d   :  { %v250_v8 = vmul.f32 %v2046_v18, %v185_v26 }
 0x14e   :  { %953 = vperm.xlu1 %1537, %v803_v23  }
 0x14f   :  { %v446_v13 = vadd.f32 %v414_v12, %v250_v8  ;;  %v418_v8 = vmul.f32 %v2041_v46, %v2021_v38 }
 0x150   :  { %v190_v16 = vpop.permute.xlu1 %189 }
 0x151   :  { %v251_v27 = vmul.f32 %v2046_v18, %v190_v16 }
 0x152   :  { %873 = vperm.xlu1 %1537, %v787_v29  }
 0x155   :  { %v2306_v19 = vpop.eup %1580  ;;  %v360_v57 = vpop.permute.xlu1 %359 }
 0x156   :  { %963 = vperm.xlu1 %1537, %v805_v5   ;;  %v1420_v9 = vpack.c.bf16 %v2304_v14, %v2306_v19  ;;  %v415_v52 = vmul.f32 %v2041_v46, %v360_v57  ;;  %v2320_v39 = vpop.eup %1582  ;;  %v416_v57 = vmul.f32 %v2041_v46, %v2011_v33 }
 0x158   :  { %1421 = vmatpush1.bf16.msra.mxu0 %v1420_v9  ;;  %1495 = vmatpush1.bf16.msra.mxu1 %v1420_v9  ;;  %v447_v63 = vadd.f32 %v415_v52, %v251_v27 }
 0x159   :  { %1422 = vmatprep.subr.bf16.mxu0 %v1668_v35  ;;  %1480 = vmatprep.subr.bf16.mxu1 %v1668_v35 }
 0x15a   :  { %883 = vperm.xlu1 %1537, %v789_v28   ;;  %v599_v49 = vpop.permute.xlu1 %598  ;;  %v671_v42 = vadd.f32 %v614_v60, %v447_v63 }
 0x15b   :  { %v668_v1 = vadd.f32 %v599_v49, %v444_v15 }
 0x15d   :  { %1584 = vtanh.f32 %v668_v1 }
 0x15e   :  { %v195_v58 = vpop.permute.xlu1 %194  ;;  %1586 = vtanh.f32 %v671_v42 }
 0x15f   :  { %v252_v21 = vmul.f32 %v2046_v18, %v195_v58 }
 0x161   :  { %v448_v28 = vadd.f32 %v416_v57, %v252_v21 }
 0x162   :  { %v200_v56 = vpop.permute.xlu1 %199 }
 0x163   :  { %v253_v29 = vmul.f32 %v2046_v18, %v200_v56 }
 0x167   :  { %v2322_v6 = vpop.eup %1584  ;;  %v368_v50 = vpop.permute.xlu1 %367 }
 0x168   :  { %v1423_v11 = vpack.c.bf16 %v2320_v39, %v2322_v6  ;;  %v417_v23 = vmul.f32 %v2041_v46, %v368_v50  ;;  %v2333_v31 = vpop.eup %1586  ;;  %v634_v50 = vpop.permute.xlu0 %633 }
 0x16a   :  { %1424 = vmatpush1.bf16.msra.mxu0 %v1423_v11  ;;  %1496 = vmatpush1.bf16.msra.mxu1 %v1423_v11  ;;  %v449_v16 = vadd.f32 %v417_v23, %v253_v29 }
 0x16b   :  { %1425 = vmatprep.subr.bf16.mxu0 %v1668_v35  ;;  %1481 = vmatprep.subr.bf16.mxu1 %v1668_v35 }
 0x16c   :  { %v673_v9 = vadd.f32 %v624_v0, %v449_v16  ;;  %v710_v0 = vld [vmem:[%s2733_s3] sm:$0xff] }
 0x16d   :  { %v609_v4 = vpop.permute.xlu1 %608 }
 0x16e   :  { %v670_v17 = vadd.f32 %v609_v4, %v446_v13  ;;  %v420_v4 = vmul.f32 %v2041_v46, %v2027_v41 }
 0x170   :  { %1588 = vtanh.f32 %v670_v17 }
 0x171   :  { %v205_v20 = vpop.permute.xlu1 %204  ;;  %1590 = vtanh.f32 %v673_v9  ;;  %v744_v9 = vld [vmem:[%s2733_s3 + $0x110] sm:$0xff] }
 0x172   :  { %v254_v56 = vmul.f32 %v2046_v18, %v205_v20 }
 0x174   :  { %v450_v12 = vadd.f32 %v418_v8, %v254_v56  ;;  %v751_v56 = vld [vmem:[%s2733_s3 + $0x148] sm:$0xff] }
 0x175   :  { %v210_v26 = vpop.permute.xlu1 %209  ;;  %v719_v8 = vld [vmem:[%s2733_s3 + $0x48] sm:$0xff] }
 0x176   :  { %v255_v1 = vmul.f32 %v2046_v18, %v210_v26 }
 0x17a   :  { %v2335_v36 = vpop.eup %1588  ;;  %v376_v5 = vpop.permute.xlu1 %375 }
 0x17b   :  { %v1426_v44 = vpack.c.bf16 %v2333_v31, %v2335_v36  ;;  %v419_v15 = vmul.f32 %v2041_v46, %v376_v5  ;;  %v2346_v33 = vpop.eup %1590 }
 0x17d   :  { %1427 = vmatpush1.bf16.msra.mxu0 %v1426_v44  ;;  %1497 = vmatpush1.bf16.msra.mxu1 %v1426_v44  ;;  %v451_v58 = vadd.f32 %v419_v15, %v255_v1  ;;  %v749_v15 = vld [vmem:[%s2733_s3 + $0x138] sm:$0xff]  ;;  %v748_v1 = vld [vmem:[%s2733_s3 + $0x130] sm:$0xff] }
 0x17e   :  { %1428 = vmatprep.subr.bf16.mxu0 %v1668_v35  ;;  %1482 = vmatprep.subr.bf16.mxu1 %v1668_v35 }
 0x17f   :  { %v619_v45 = vpop.permute.xlu1 %618  ;;  %v675_v11 = vadd.f32 %v634_v50, %v451_v58  ;;  %v717_v58 = vld [vmem:[%s2733_s3 + $0x38] sm:$0xff] }
 0x180   :  { %v672_v48 = vadd.f32 %v619_v45, %v448_v28  ;;  %v747_v28 = vld [vmem:[%s2733_s3 + $0x128] sm:$0xff]  ;;  %v712_v45 = vld [vmem:[%s2733_s3 + $0x10] sm:$0xff]  ;;  %v753_v50 = vld [vmem:[%s2733_s3 + $0x158] sm:$0xff] }
 0x182   :  { %1592 = vtanh.f32 %v672_v48  ;;  %v746_v48 = vld [vmem:[%s2733_s3 + $0x120] sm:$0xff] }
 0x183   :  { %v215_v7 = vpop.permute.xlu1 %214  ;;  %1594 = vtanh.f32 %v675_v11  ;;  %v718_v11 = vld [vmem:[%s2733_s3 + $0x40] sm:$0xff] }
 0x184   :  { %v256_v60 = vmul.f32 %v2046_v18, %v215_v7  ;;  %v715_v7 = vld [vmem:[%s2733_s3 + $0x28] sm:$0xff] }
 0x186   :  { %v452_v20 = vadd.f32 %v420_v4, %v256_v60  ;;  %v721_v60 = vld [vmem:[%s2733_s3 + $0x58] sm:$0xff]  ;;  %v754_v4 = vld [vmem:[%s2733_s3 + $0x160] sm:$0xff] }
 0x187   :  { %v220_v49 = vpop.permute.xlu1 %219 }
 0x188   :  { %v257_v23 = vmul.f32 %v2046_v18, %v220_v49  ;;  %v714_v49 = vld [vmem:[%s2733_s3 + $0x20] sm:$0xff] }
 0x18c   :  { %v2348_v52 = vpop.eup %1592  ;;  %v384_v27 = vpop.permute.xlu1 %383 }
 0x18d   :  { %v1429_v63 = vpack.c.bf16 %v2346_v33, %v2348_v52  ;;  %v421_v17 = vmul.f32 %v2041_v46, %v384_v27  ;;  %v2362_v5 = vpop.eup %1594  ;;  %v716_v27 = vld [vmem:[%s2733_s3 + $0x30] sm:$0xff] }
 0x18f   :  { %1430 = vmatpush1.bf16.msra.mxu0 %v1429_v63  ;;  %1498 = vmatpush1.bf16.msra.mxu1 %v1429_v63  ;;  %v453_v29 = vadd.f32 %v421_v17, %v257_v23  ;;  %v750_v63 = vld [vmem:[%s2733_s3 + $0x140] sm:$0xff]  ;;  %v723_v17 = vld [vmem:[%s2733_s3 + $0x68] sm:$0xff]  ;;  %v756_v23 = vld [vmem:[%s2733_s3 + $0x170] sm:$0xff] }
 0x190   :  { %1431 = vmatprep.subr.bf16.mxu0 %v1668_v35  ;;  %1483 = vmatprep.subr.bf16.mxu1 %v1668_v35 }
 0x191   :  { %v629_v42 = vpop.permute.xlu1 %628 }
 0x192   :  { %v674_v13 = vadd.f32 %v629_v42, %v450_v12  ;;  %v752_v12 = vld [vmem:[%s2733_s3 + $0x150] sm:$0xff]  ;;  %v755_v42 = vld [vmem:[%s2733_s3 + $0x168] sm:$0xff] }
 0x194   :  { %1596 = vtanh.f32 %v674_v13  ;;  %v720_v13 = vld [vmem:[%s2733_s3 + $0x50] sm:$0xff] }
 0x195   :  { %v639_v38 = vpop.permute.xlu1 %638 }
 0x196   :  { %v676_v26 = vadd.f32 %v639_v38, %v452_v20  ;;  %v757_v38 = vld [vmem:[%s2733_s3 + $0x178] sm:$0xff]  ;;  %v722_v20 = vld [vmem:[%s2733_s3 + $0x60] sm:$0xff] }
 0x198   :  { %1598 = vtanh.f32 %v676_v26  ;;  %v725_v26 = vld [vmem:[%s2733_s3 + $0x78] sm:$0xff] }
 0x199   :  { %v644_v16 = vpop.permute.xlu1 %643 }
 0x19a   :  { %v677_v21 = vadd.f32 %v644_v16, %v453_v29  ;;  %v759_v29 = vld [vmem:[%s2733_s3 + $0x188] sm:$0xff]  ;;  %v724_v16 = vld [vmem:[%s2733_s3 + $0x70] sm:$0xff] }
 0x19c   :  { %1600 = vtanh.f32 %v677_v21  ;;  %v758_v21 = vld [vmem:[%s2733_s3 + $0x180] sm:$0xff] }
 0x19e   :  { %v2364_v44 = vpop.eup %1596 }
 0x19f   :  { %v1432_v41 = vpack.c.bf16 %v2362_v5, %v2364_v44 }
 0x1a1   :  { %1433 = vmatpush1.bf16.msra.mxu0 %v1432_v41  ;;  %1499 = vmatpush1.bf16.msra.mxu1 %v1432_v41  ;;  %v727_v41 = vld [vmem:[%s2733_s3 + $0x88] sm:$0xff] }
 0x1a2   :  { %1434 = vmatprep.subr.bf16.mxu0 %v1668_v35  ;;  %1484 = vmatprep.subr.bf16.mxu1 %v1668_v35  ;;  %v2370_v46 = vpop.eup %1598  ;;  %v713_v35 = vld [vmem:[%s2733_s3 + $0x18] sm:$0xff] }
 0x1a6   :  { %v2372_v18 = vpop.eup %1600 }
 0x1a7   :  { %v1435_v57 = vpack.c.bf16 %v2372_v18, %v2370_v46 }
 0x1a9   :  { %1436 = vmatpush1.bf16.msra.mxu0 %v1435_v57  ;;  %1500 = vmatpush1.bf16.msra.mxu1 %v1435_v57  ;;  %v761_v57 = vld [vmem:[%s2733_s3 + $0x198] sm:$0xff] }
 0x1ac   :  { %1031 = vmatmul.mubr.f32.vlgmr.msra.gmra.mrb[0].mxu0 %v710_v0  ;;  %1116 = vmatmul.mubr.f32.vlgmr.msra.gmra.mrb[0].mxu1 %v744_v9  ;;  %v726_v0 = vld [vmem:[%s2733_s3 + $0x80] sm:$0xff]  ;;  %v760_v9 = vld [vmem:[%s2733_s3 + $0x190] sm:$0xff] }
 0x1ad   :  { %1035 = vmatprep.mubr.f32.mxu0 %v713_v35  ;;  %1120 = vmatprep.mubr.f32.mxu1 %v747_v28  ;;  %v729_v35 = vld [vmem:[%s2733_s3 + $0x98] sm:$0xff]  ;;  %v763_v28 = vld [vmem:[%s2733_s3 + $0x1a8] sm:$0xff] }
 0x1b0   :  { %1036 = vmatmul.mubr.f32.gmra.mrb[2].mxu0 %v712_v45  ;;  %1121 = vmatmul.mubr.f32.gmra.mrb[2].mxu1 %v746_v48  ;;  %v728_v45 = vld [vmem:[%s2733_s3 + $0x90] sm:$0xff]  ;;  %v762_v48 = vld [vmem:[%s2733_s3 + $0x1a0] sm:$0xff] }
 0x1b1   :  { %1040 = vmatprep.mubr.f32.mxu0 %v715_v7  ;;  %1125 = vmatprep.mubr.f32.mxu1 %v749_v15  ;;  %v731_v7 = vld [vmem:[%s2733_s3 + $0xa8] sm:$0xff]  ;;  %v765_v15 = vld [vmem:[%s2733_s3 + $0x1b8] sm:$0xff] }
 0x1b4   :  { %1041 = vmatmul.mubr.f32.gmra.mrb[4].mxu0 %v714_v49  ;;  %1126 = vmatmul.mubr.f32.gmra.mrb[4].mxu1 %v748_v1  ;;  %v730_v49 = vld [vmem:[%s2733_s3 + $0xa0] sm:$0xff]  ;;  %v764_v1 = vld [vmem:[%s2733_s3 + $0x1b0] sm:$0xff] }
 0x1b5   :  { %1045 = vmatprep.mubr.f32.mxu0 %v717_v58  ;;  %1130 = vmatprep.mubr.f32.mxu1 %v751_v56  ;;  %v733_v58 = vld [vmem:[%s2733_s3 + $0xb8] sm:$0xff]  ;;  %v767_v56 = vld [vmem:[%s2733_s3 + $0x1c8] sm:$0xff] }
 0x1b8   :  { %1046 = vmatmul.mubr.f32.gmra.mrb[6].mxu0 %v716_v27  ;;  %1131 = vmatmul.mubr.f32.gmra.mrb[6].mxu1 %v750_v63  ;;  %v732_v27 = vld [vmem:[%s2733_s3 + $0xb0] sm:$0xff]  ;;  %v766_v63 = vld [vmem:[%s2733_s3 + $0x1c0] sm:$0xff] }
 0x1b9   :  { %1050 = vmatprep.mubr.f32.mxu0 %v719_v8  ;;  %1135 = vmatprep.mubr.f32.mxu1 %v753_v50  ;;  %v735_v8 = vld [vmem:[%s2733_s3 + $0xc8] sm:$0xff]  ;;  %v769_v50 = vld [vmem:[%s2733_s3 + $0x1d8] sm:$0xff] }
 0x1bc   :  { %1051 = vmatmul.mubr.f32.gmra.mrb[8].mxu0 %v718_v11  ;;  %1136 = vmatmul.mubr.f32.gmra.mrb[8].mxu1 %v752_v12  ;;  %v734_v11 = vld [vmem:[%s2733_s3 + $0xc0] sm:$0xff]  ;;  %v768_v12 = vld [vmem:[%s2733_s3 + $0x1d0] sm:$0xff] }
 0x1bd   :  { %1055 = vmatprep.mubr.f32.mxu0 %v721_v60  ;;  %1140 = vmatprep.mubr.f32.mxu1 %v755_v42  ;;  %v737_v60 = vld [vmem:[%s2733_s3 + $0xd8] sm:$0xff]  ;;  %v771_v42 = vld [vmem:[%s2733_s3 + $0x1e8] sm:$0xff] }
 0x1c0   :  { %1056 = vmatmul.mubr.f32.gmra.mrb[10].mxu0 %v720_v13  ;;  %1141 = vmatmul.mubr.f32.gmra.mrb[10].mxu1 %v754_v4  ;;  %v736_v13 = vld [vmem:[%s2733_s3 + $0xd0] sm:$0xff]  ;;  %v770_v4 = vld [vmem:[%s2733_s3 + $0x1e0] sm:$0xff] }
 0x1c1   :  { %1060 = vmatprep.mubr.f32.mxu0 %v723_v17  ;;  %1145 = vmatprep.mubr.f32.mxu1 %v757_v38  ;;  %v739_v17 = vld [vmem:[%s2733_s3 + $0xe8] sm:$0xff]  ;;  %v773_v38 = vld [vmem:[%s2733_s3 + $0x1f8] sm:$0xff] }
 0x1c4   :  { %1061 = vmatmul.mubr.f32.gmra.mrb[12].mxu0 %v722_v20  ;;  %1146 = vmatmul.mubr.f32.gmra.mrb[12].mxu1 %v756_v23  ;;  %v738_v20 = vld [vmem:[%s2733_s3 + $0xe0] sm:$0xff]  ;;  %v772_v23 = vld [vmem:[%s2733_s3 + $0x1f0] sm:$0xff] }
 0x1c5   :  { %1065 = vmatprep.mubr.f32.mxu0 %v725_v26  ;;  %1150 = vmatprep.mubr.f32.mxu1 %v759_v29  ;;  %v741_v26 = vld [vmem:[%s2733_s3 + $0xf8] sm:$0xff]  ;;  %v740_v29 = vld [vmem:[%s2733_s3 + $0xf0] sm:$0xff] }
 0x1c8   :  { %1066 = vmatmul.mubr.f32.gmra.mrb[14].mxu0 %v724_v16  ;;  %1151 = vmatmul.mubr.f32.gmra.mrb[14].mxu1 %v758_v21  ;;  %v743_v16 = vld [vmem:[%s2733_s3 + $0x108] sm:$0xff]  ;;  %v742_v21 = vld [vmem:[%s2733_s3 + $0x100] sm:$0xff] }
 0x1c9   :  { %1070 = vmatprep.mubr.f32.mxu0 %v727_v41  ;;  %1155 = vmatprep.mubr.f32.mxu1 %v761_v57  ;;  %v2562_v41 = vpop.permute.xlu0 %888 }
 0x1cc   :  { %1071 = vmatmul.mubr.f32.gmra.mrb[16].mxu0 %v726_v0  ;;  %1156 = vmatmul.mubr.f32.gmra.mrb[16].mxu1 %v760_v9  ;;  %v2564_v0 = vpop.permute.xlu1 %893 }
 0x1cd   :  { %1075 = vmatprep.mubr.f32.mxu0 %v729_v35  ;;  %1160 = vmatprep.mubr.f32.mxu1 %v763_v28  ;;  %v809_v57 = vpop.permute.xlu0 %808 }
 0x1d0   :  { %1076 = vmatmul.mubr.f32.gmra.mrb[18].mxu0 %v728_v45  ;;  %1161 = vmatmul.mubr.f32.gmra.mrb[18].mxu1 %v762_v48  ;;  %v814_v35 = vpop.permute.xlu1 %813 }
 0x1d1   :  { %1080 = vmatprep.mubr.f32.mxu0 %v731_v7  ;;  %1165 = vmatprep.mubr.f32.mxu1 %v765_v15  ;;  %v899_v9 = vpop.permute.xlu0 %898  ;;  %v1262_v15 = vlaneseq }
 0x1d4   :  { %1081 = vmatmul.mubr.f32.gmra.mrb[20].mxu0 %v730_v49  ;;  %1166 = vmatmul.mubr.f32.gmra.mrb[20].mxu1 %v764_v1  ;;  %v904_v45 = vpop.permute.xlu1 %903  ;;  %v2566_v49 = vshrl.u32 %v1262_v15, 7 }
 0x1d5   :  { %1085 = vmatprep.mubr.f32.mxu0 %v733_v58  ;;  %1170 = vmatprep.mubr.f32.mxu1 %v767_v56  ;;  %v819_v28 = vpop.permute.xlu0 %818  ;;  %v2571_v58 = vld [vmem:[%s2734_s5] sm:$0x3] }
 0x1d6   :  { %2744 = vst [vmem:[#allocation6_spill] sm:$0xff] %v2566_v49  ;;  %2745 = vst [vmem:[#allocation7_spill] sm:$0xff] %v2571_v58 }
 0x1d8   :  { %1086 = vmatmul.mubr.f32.gmra.mrb[22].mxu0 %v732_v27  ;;  %1171 = vmatmul.mubr.f32.gmra.mrb[22].mxu1 %v766_v63  ;;  %v824_v7 = vpop.permute.xlu1 %823  ;;  %v1273_v27 = vsub.s32 1, %v2566_v49 }
 0x1d9   :  { %1090 = vmatprep.mubr.f32.mxu0 %v735_v8  ;;  %1175 = vmatprep.mubr.f32.mxu1 %v769_v50  ;;  %v909_v48 = vpop.permute.xlu0 %908 }
 0x1da   :  { %v1274_v63 = vrot.slane %v2571_v58, %v1273_v27 }
 0x1dc   :  { %1091 = vmatmul.mubr.f32.gmra.mrb[24].mxu0 %v734_v11  ;;  %1176 = vmatmul.mubr.f32.gmra.mrb[24].mxu1 %v768_v12  ;;  %v914_v56 = vpop.permute.xlu1 %913 }
 0x1dd   :  { %1095 = vmatprep.mubr.f32.mxu0 %v737_v60  ;;  %1180 = vmatprep.mubr.f32.mxu1 %v771_v42  ;;  %v829_v1 = vpop.permute.xlu0 %828 }
 0x1e0   :  { %1096 = vmatmul.mubr.f32.gmra.mrb[26].mxu0 %v736_v13  ;;  %1181 = vmatmul.mubr.f32.gmra.mrb[26].mxu1 %v770_v4  ;;  %v834_v50 = vpop.permute.xlu1 %833 }
 0x1e1   :  { %1100 = vmatprep.mubr.f32.mxu0 %v739_v17  ;;  %1185 = vmatprep.mubr.f32.mxu1 %v773_v38  ;;  %v919_v8 = vpop.permute.xlu0 %918 }
 0x1e4   :  { %1101 = vmatmul.mubr.f32.gmra.mrb[28].mxu0 %v738_v20  ;;  %1186 = vmatmul.mubr.f32.gmra.mrb[28].mxu1 %v772_v23  ;;  %v2577_v12 = vpop.permute.xlu1 %923 }
 0x1e5   :  { %1105 = vmatprep.mubr.f32.mxu0 %v741_v26  ;;  %1341 = vmatprep.mubr.f32.mxu1 %v1274_v63  ;;  %v2575_v11 = vpop.permute.xlu0 %838 }
 0x1e8   :  { %1106 = vmatmul.mubr.f32.gmra.mrb[30].mxu0 %v740_v29  ;;  %v2581_v42 = vpop.permute.xlu1 %843 }
 0x1e9   :  { %1110 = vmatprep.mubr.f32.mxu0 %v743_v16  ;;  %v2579_v60 = vpop.permute.xlu0 %928 }
 0x1ec   :  { %1111 = vmatmul.mubr.f32.gmra.mrb[32].mxu0 %v742_v21  ;;  %v2587_v63 = vpop.permute.xlu1 %933 }
 0x1ed   :  { %v2585_v27 = vpop.permute.xlu0 %848 }
 0x27f   :  { %v1032_v13 = vpop.f32.mrb[0].mxu0  ;;  %v2583_v4 = vpop.f32.mrb[0].mxu1 }
 0x280   :  { %v1033_v17 = vadd.f32 %v1032_v13, %v809_v57  ;;  %v1034_v38 = vpop.f32.mrb[1].mxu0  ;;  %v1119_v20 = vpop.f32.mrb[1].mxu1 }
 0x282   :  { %1602 = vtanh.f32 %v1033_v17 }
 0x283   :  { %v1037_v23 = vpop.f32.mrb[2].mxu0  ;;  %v1122_v26 = vpop.f32.mrb[2].mxu1 }
 0x284   :  { %v1038_v29 = vadd.f32 %v1037_v23, %v814_v35  ;;  %v1039_v16 = vpop.f32.mrb[3].mxu0  ;;  %v1124_v21 = vpop.f32.mrb[3].mxu1  ;;  %v1123_v15 = vadd.f32 %v1122_v26, %v899_v9 }
 0x285   :  { %v2589_v26 = vpop.permute.xlu0 %938  ;;  %v2591_v16 = vpop.permute.xlu1 %853 }
 0x286   :  { %1604 = vtanh.f32 %v1038_v29 }
 0x287   :  { %v1042_v58 = vpop.f32.mrb[4].mxu0  ;;  %v1127_v49 = vpop.f32.mrb[4].mxu1  ;;  %1606 = vtanh.f32 %v1123_v15 }
 0x288   :  { %v1043_v24 = vadd.f32 %v1042_v58, %v819_v28  ;;  %v1128_v43 = vadd.f32 %v1127_v49, %v904_v45  ;;  %v1044_v55 = vpop.f32.mrb[5].mxu0  ;;  %v1129_v57 = vpop.f32.mrb[5].mxu1 }
 0x28a   :  { %1608 = vtanh.f32 %v1128_v43 }
 0x28b   :  { %v1047_v13 = vpop.f32.mrb[6].mxu0  ;;  %v1132_v38 = vpop.f32.mrb[6].mxu1  ;;  %1610 = vtanh.f32 %v1043_v24 }
 0x28c   :  { %v1048_v35 = vadd.f32 %v1047_v13, %v824_v7  ;;  %v1049_v17 = vpop.f32.mrb[7].mxu0  ;;  %v1134_v20 = vpop.f32.mrb[7].mxu1  ;;  %v1133_v9 = vadd.f32 %v1132_v38, %v909_v48 }
 0x28d   :  { %v1603_v23 = vpop.eup %1602  ;;  %v2601_v20 = vpop.permute.xlu0 %858 }
 0x28e   :  { %1612 = vtanh.f32 %v1048_v35  ;;  %v2594_v24 = vadd.f32 %v1603_v23, %v2097_v34  ;;  %v2603_v34 = vpop.permute.xlu1 %943 }
 0x28f   :  { %v1052_v29 = vpop.f32.mrb[8].mxu0  ;;  %v1137_v28 = vpop.f32.mrb[8].mxu1  ;;  %1614 = vtanh.f32 %v1133_v9 }
 0x290   :  { %v1605_v45 = vpop.eup %1604  ;;  %v1053_v55 = vadd.f32 %v1052_v29, %v829_v1  ;;  %v1138_v49 = vadd.f32 %v1137_v28, %v914_v56  ;;  %v1054_v58 = vpop.f32.mrb[9].mxu0 }
 0x291   :  { %v1139_v43 = vpop.f32.mrb[9].mxu1  ;;  %v2597_v7 = vadd.f32 %v1605_v45, %v2105_v3  ;;  %v1607_v48 = vpop.eup %1606 }
 0x292   :  { %1616 = vtanh.f32 %v1138_v49  ;;  %v2606_v3 = vadd.f32 %v1607_v48, %v2278_v22 }
 0x293   :  { %v1057_v21 = vpop.f32.mrb[10].mxu0  ;;  %v1142_v15 = vpop.f32.mrb[10].mxu1  ;;  %v1439_v57 = vpack.c.bf16 %v2597_v7, %v2594_v24  ;;  %1618 = vtanh.f32 %v1053_v55 }
 0x294   :  { %v1058_v13 = vadd.f32 %v1057_v21, %v834_v50  ;;  %v1059_v1 = vpop.f32.mrb[11].mxu0  ;;  %v1144_v56 = vpop.f32.mrb[11].mxu1  ;;  %v1143_v35 = vadd.f32 %v1142_v15, %v919_v8 }
 0x295   :  { %v1609_v38 = vpop.eup %1608  ;;  %v949_v56 = vpop.permute.xlu0 %948 }
 0x296   :  { %v1611_v17 = vpop.eup %1610  ;;  %1620 = vtanh.f32 %v1058_v13  ;;  %v2609_v9 = vadd.f32 %v1609_v38, %v2276_v59  ;;  %v864_v38 = vpop.permute.xlu1 %863 }
 0x297   :  { %v1062_v23 = vpop.f32.mrb[12].mxu0  ;;  %v1147_v29 = vpop.f32.mrb[12].mxu1  ;;  %1622 = vtanh.f32 %v1143_v35  ;;  %v2616_v58 = vadd.f32 %v1611_v17, %v2112_v51 }
 0x298   :  { %v1613_v28 = vpop.eup %1612  ;;  %v1063_v50 = vadd.f32 %v1062_v23, %v2575_v11  ;;  %v1148_v45 = vadd.f32 %v1147_v29, %v2577_v12  ;;  %v1064_v8 = vpop.f32.mrb[13].mxu0  ;;  %v1441_v49 = vpack.c.bf16 %v2609_v9, %v2606_v3 }
 0x299   :  { %v1149_v55 = vpop.f32.mrb[13].mxu1  ;;  %v2619_v22 = vadd.f32 %v1613_v28, %v2115_v47  ;;  %v1615_v59 = vpop.eup %1614 }
 0x29a   :  { %1624 = vtanh.f32 %v1148_v45  ;;  %v2626_v47 = vadd.f32 %v1615_v59, %v2306_v19 }
 0x29b   :  { %v1067_v43 = vpop.f32.mrb[14].mxu0  ;;  %v1152_v48 = vpop.f32.mrb[14].mxu1  ;;  %v1443_v11 = vpack.c.bf16 %v2619_v22, %v2616_v58  ;;  %1626 = vtanh.f32 %v1063_v50 }
 0x29c   :  { %v1068_v12 = vadd.f32 %v1067_v43, %v2581_v42  ;;  %v1069_v21 = vpop.f32.mrb[15].mxu0  ;;  %v1154_v15 = vpop.f32.mrb[15].mxu1  ;;  %v1153_v1 = vadd.f32 %v1152_v48, %v2579_v60 }
 0x29d   :  { %v1617_v13 = vpop.eup %1616  ;;  %v869_v15 = vpop.permute.xlu0 %868 }
 0x29e   :  { %v1619_v51 = vpop.eup %1618  ;;  %1628 = vtanh.f32 %v1068_v12  ;;  %v2629_v35 = vadd.f32 %v1617_v13, %v2304_v14  ;;  %v954_v13 = vpop.permute.xlu1 %953 }
 0x29f   :  { %v1072_v17 = vpop.f32.mrb[16].mxu0  ;;  %v1157_v23 = vpop.f32.mrb[16].mxu1  ;;  %1630 = vtanh.f32 %v1153_v1  ;;  %v2636_v8 = vadd.f32 %v1619_v51, %v2121_v53 }
 0x2a0   :  { %v1621_v29 = vpop.eup %1620  ;;  %v1073_v42 = vadd.f32 %v1072_v17, %v2585_v27  ;;  %v1158_v28 = vadd.f32 %v1157_v23, %v2587_v63  ;;  %v1074_v50 = vpop.f32.mrb[17].mxu0  ;;  %v1445_v60 = vpack.c.bf16 %v2629_v35, %v2626_v47 }
 0x2a1   :  { %v1159_v45 = vpop.f32.mrb[17].mxu1  ;;  %v2639_v19 = vadd.f32 %v1621_v29, %v2123_v30  ;;  %v1623_v14 = vpop.eup %1622 }
 0x2a2   :  { %1632 = vtanh.f32 %v1158_v28  ;;  %v2646_v30 = vadd.f32 %v1623_v14, %v2322_v6 }
 0x2a3   :  { %v1077_v55 = vpop.f32.mrb[18].mxu0  ;;  %v1162_v59 = vpop.f32.mrb[18].mxu1  ;;  %v1447_v27 = vpack.c.bf16 %v2639_v19, %v2636_v8  ;;  %1634 = vtanh.f32 %v1073_v42 }
 0x2a4   :  { %v1078_v63 = vadd.f32 %v1077_v55, %v2591_v16  ;;  %v1079_v43 = vpop.f32.mrb[19].mxu0  ;;  %v1164_v48 = vpop.f32.mrb[19].mxu1  ;;  %v1163_v21 = vadd.f32 %v1162_v59, %v2589_v26 }
 0x2a5   :  { %v1625_v12 = vpop.eup %1624 }
 0x2a6   :  { %v1627_v53 = vpop.eup %1626  ;;  %1636 = vtanh.f32 %v1078_v63  ;;  %v2649_v1 = vadd.f32 %v1625_v12, %v2320_v39  ;;  %v959_v12 = vpop.permute.xlu0 %958 }
 0x2a7   :  { %v1082_v51 = vpop.f32.mrb[20].mxu0  ;;  %v1167_v17 = vpop.f32.mrb[20].mxu1  ;;  %1638 = vtanh.f32 %v1163_v21  ;;  %v2656_v50 = vadd.f32 %v1627_v53, %v2133_v61 }
 0x2a8   :  { %v1629_v23 = vpop.eup %1628  ;;  %v1083_v16 = vadd.f32 %v1082_v51, %v2601_v20  ;;  %v1168_v29 = vadd.f32 %v1167_v17, %v2603_v34  ;;  %v1084_v42 = vpop.f32.mrb[21].mxu0  ;;  %v1449_v26 = vpack.c.bf16 %v2649_v1, %v2646_v30 }
 0x2a9   :  { %v1169_v28 = vpop.f32.mrb[21].mxu1  ;;  %v2659_v6 = vadd.f32 %v1629_v23, %v2135_v2  ;;  %v1631_v39 = vpop.eup %1630 }
 0x2aa   :  { %1640 = vtanh.f32 %v1168_v29  ;;  %v874_v61 = vpop.permute.xlu1 %873  ;;  %v2664_v2 = vadd.f32 %v1631_v39, %v2335_v36 }
 0x2ab   :  { %v1087_v45 = vpop.f32.mrb[22].mxu0  ;;  %v1172_v14 = vpop.f32.mrb[22].mxu1  ;;  %v1451_v20 = vpack.c.bf16 %v2659_v6, %v2656_v50  ;;  %1642 = vtanh.f32 %v1083_v16 }
 0x2ac   :  { %v1088_v34 = vadd.f32 %v1087_v45, %v864_v38  ;;  %v1089_v55 = vpop.f32.mrb[23].mxu0  ;;  %v1174_v59 = vpop.f32.mrb[23].mxu1  ;;  %v1173_v43 = vadd.f32 %v1172_v14, %v949_v56 }
 0x2ad   :  { %v1633_v63 = vpop.eup %1632 }
 0x2ae   :  { %v1635_v48 = vpop.eup %1634  ;;  %1644 = vtanh.f32 %v1088_v34  ;;  %v2667_v21 = vadd.f32 %v1633_v63, %v2333_v31  ;;  %v964_v55 = vpop.permute.xlu1 %963 }
 0x2af   :  { %v1092_v53 = vpop.f32.mrb[24].mxu0  ;;  %v1177_v51 = vpop.f32.mrb[24].mxu1  ;;  %1646 = vtanh.f32 %v1173_v43  ;;  %v2672_v42 = vadd.f32 %v1635_v48, %v2147_v25 }
 0x2b0   :  { %v1637_v17 = vpop.eup %1636  ;;  %v1093_v23 = vadd.f32 %v1092_v53, %v869_v15  ;;  %v1178_v16 = vadd.f32 %v1177_v51, %v954_v13  ;;  %v1094_v38 = vpop.f32.mrb[25].mxu0  ;;  %v1453_v56 = vpack.c.bf16 %v2667_v21, %v2664_v2 }
 0x2b1   :  { %v1179_v29 = vpop.f32.mrb[25].mxu1  ;;  %v2675_v36 = vadd.f32 %v1637_v17, %v2142_v40  ;;  %v1639_v28 = vpop.eup %1638 }
 0x2b2   :  { %1648 = vtanh.f32 %v1178_v16  ;;  %v879_v25 = vpop.permute.xlu0 %878  ;;  %v1249_v40 = vadd.f32 %v1639_v28, %v2348_v52 }
 0x2b3   :  { %v1097_v31 = vpop.f32.mrb[26].mxu0  ;;  %v1182_v39 = vpop.f32.mrb[26].mxu1  ;;  %v1455_v15 = vpack.c.bf16 %v2675_v36, %v2672_v42  ;;  %1650 = vtanh.f32 %v1093_v23 }
 0x2b4   :  { %v1098_v13 = vadd.f32 %v1097_v31, %v874_v61  ;;  %v1099_v45 = vpop.f32.mrb[27].mxu0  ;;  %v1184_v14 = vpop.f32.mrb[27].mxu1  ;;  %v1183_v59 = vadd.f32 %v1182_v39, %v959_v12 }
 0x2b5   :  { %v1641_v34 = vpop.eup %1640  ;;  %v884_v39 = vpop.permute.xlu1 %883 }
 0x2b6   :  { %v1643_v63 = vpop.eup %1642  ;;  %1652 = vtanh.f32 %v1098_v13  ;;  %v1250_v43 = vadd.f32 %v1641_v34, %v2346_v33  ;;  %v1118_v33 = vadd.f32 %v2583_v4, %v2564_v0  ;;  %v1260_v7 = vpop.permute.xlu0 %1259 }
 0x2b7   :  { %v1102_v48 = vpop.f32.mrb[28].mxu0  ;;  %v1187_v53 = vpop.f32.mrb[28].mxu1  ;;  %1654 = vtanh.f32 %v1183_v59  ;;  %v1233_v29 = vadd.f32 %v1643_v63, %v2171_v32 }
 0x2b8   :  { %v1645_v51 = vpop.eup %1644  ;;  %v1103_v17 = vadd.f32 %v1102_v48, %v879_v25  ;;  %v1188_v16 = vadd.f32 %v1187_v53, %v964_v55  ;;  %v1104_v38 = vpop.f32.mrb[29].mxu0  ;;  %v1457_v23 = vpack.c.bf16 %v1250_v43, %v1249_v40 }
 0x2b9   :  { %v1189_v61 = vpop.f32.mrb[29].mxu1  ;;  %v1234_v12 = vadd.f32 %v1645_v51, %v2168_v62  ;;  %v1647_v31 = vpop.eup %1646 }
 0x2ba   :  { %1656 = vtanh.f32 %v1188_v16  ;;  %v1251_v55 = vadd.f32 %v1647_v31, %v2364_v44  ;;  %v2747_v31 = vld [vmem:[#allocation5_spill] sm:$0xff] }
 0x2bb   :  { %v1107_v13 = vpop.f32.mrb[30].mxu0  ;;  %v1459_v52 = vpack.c.bf16 %v1234_v12, %v1233_v29  ;;  %1658 = vtanh.f32 %v1103_v17 }
 0x2bc   :  { %v1108_v28 = vadd.f32 %v1107_v13, %v884_v39  ;;  %v1109_v45 = vpop.f32.mrb[31].mxu0  ;;  %v1649_v14 = vpop.eup %1648  ;;  %v2748_v39 = vld [vmem:[#allocation4_spill] sm:$0xff] }
 0x2bd   :  { %v1651_v34 = vpop.eup %1650  ;;  %v1252_v32 = vadd.f32 %v1649_v14, %v2362_v5 }
 0x2be   :  { %1660 = vtanh.f32 %v1108_v28  ;;  %v1235_v43 = vadd.f32 %v1651_v34, %v2193_v54 }
 0x2bf   :  { %v1112_v59 = vpop.f32.mrb[32].mxu0  ;;  %1662 = vtanh.f32 %v1118_v33  ;;  %v1461_v40 = vpack.c.bf16 %v1252_v32, %v1251_v55 }
 0x2c0   :  { %v1653_v62 = vpop.eup %1652  ;;  %v1113_v63 = vadd.f32 %v1112_v59, %v2562_v41  ;;  %v1114_v25 = vpop.f32.mrb[33].mxu0  ;;  %v2746_v41 = vld [vmem:[#allocation3_spill] sm:$0xff] }
 0x2c1   :  { %v1236_v0 = vadd.f32 %v1653_v62, %v2190_v37  ;;  %v1655_v4 = vpop.eup %1654 }
 0x2c2   :  { %1664 = vtanh.f32 %v1113_v63  ;;  %v1253_v44 = vadd.f32 %v1655_v4, %v2370_v46 }
 0x2c3   :  { %v1463_v48 = vpack.c.bf16 %v1236_v0, %v1235_v43 }
 0x2c4   :  { %v1657_v53 = vpop.eup %1656 }
 0x2c5   :  { %v1659_v51 = vpop.eup %1658  ;;  %v1254_v5 = vadd.f32 %v1657_v53, %v2372_v18  ;;  %v2750_v18 = vld [vmem:[#allocation7_spill] sm:$0xff] }
 0x2c6   :  { %v1237_v38 = vadd.f32 %v1659_v51, %v2219_v10  ;;  %v2749_v10 = vld [vmem:[#allocation6_spill] sm:$0xff] }
 0x2c7   :  { %v1465_v16 = vpack.c.bf16 %v1254_v5, %v1253_v44  ;;  %v1264_v46 = vsub.s32 0, %v2749_v10 }
 0x2c8   :  { %v1661_v17 = vpop.eup %1660 }
 0x2c9   :  { %v1238_v61 = vadd.f32 %v1661_v17, %v2746_v41  ;;  %v1663_v29 = vpop.eup %1662  ;;  %v1270_v24 = vrot.slane %v2750_v18, %v1264_v46  ;;  %v1265_v9 = vrot.slane %v1260_v7, %v1264_v46 }
 0x2ca   :  { %v1240_v13 = vadd.f32 %v1663_v29, %v2748_v39 }
 0x2cb   :  { %v1467_v12 = vpack.c.bf16 %v1238_v61, %v1237_v38 }
 0x2cc   :  { %v1665_v54 = vpop.eup %1664 }
 0x2cd   :  { %v1239_v37 = vadd.f32 %v1665_v54, %v2747_v31 }
 0x2cf   :  { %v1437_v33 = vpack.c.bf16 %v1240_v13, %v1239_v37 }
 0x2d1   :  { %1438 = vmatprep.subr.bf16.mxu1 %v1437_v33 }
 0x2d2   :  { %1440 = vmatpush3.bf16.msra.mxu1 %v1439_v57 }
 0x2d3   :  { %1442 = vmatprep.subr.bf16.mxu1 %v1441_v49 }
 0x2d6   :  { %1444 = vmatpush3.bf16.msra.mxu1 %v1443_v11 }
 0x2d7   :  { %1446 = vmatprep.subr.bf16.mxu1 %v1445_v60 }
 0x2da   :  { %1448 = vmatpush3.bf16.msra.mxu1 %v1447_v27 }
 0x2db   :  { %1450 = vmatprep.subr.bf16.mxu1 %v1449_v26 }
 0x2de   :  { %1452 = vmatpush3.bf16.msra.mxu1 %v1451_v20 }
 0x2df   :  { %1454 = vmatprep.subr.bf16.mxu1 %v1453_v56 }
 0x2e2   :  { %1456 = vmatpush3.bf16.msra.mxu1 %v1455_v15 }
 0x2e3   :  { %1458 = vmatprep.subr.bf16.mxu1 %v1457_v23 }
 0x2e6   :  { %1460 = vmatpush3.bf16.msra.mxu1 %v1459_v52 }
 0x2e7   :  { %1462 = vmatprep.subr.bf16.mxu1 %v1461_v40 }
 0x2ea   :  { %1464 = vmatpush3.bf16.msra.mxu1 %v1463_v48 }
 0x2eb   :  { %1466 = vmatprep.subr.bf16.mxu1 %v1465_v16 }
 0x2ee   :  { %1468 = vmatpush3.bf16.msra.mxu1 %v1467_v12 }
 0x2f1   :  { %1342 = vmatmul.mubr.f32.vlgmr.msra.gmra.mrb[30].mxu1 %v1270_v24 }
 0x3c4   :  { %v1386_v57 = vpop.f32.mrb[30].mxu1 }
 0x3c5   :  { %v1387_v3 = vpop.f32.mrb[31].mxu1 }
 0x3c6   :  { %v1388_v49 = vadd.f32 %v1387_v3, %v1386_v57 }
 0x3c8   :  { %v1344_v58 = vadd.f32 %v1388_v49, %v1265_v9 }
 0x3ca   :  { %1347 = vst [vmem:[%s2735_s7] sm:$0x1] %v1344_v58 }

</bundles_post_ra>
